<compile_context>
chip_gen: v7x
topology: tpu7x:2x2x1
jax: 0.10.0
libtpu: 0.0.40
codegen_flags: <defaults>
</compile_context>

<pallas_src>
import jax
import jax.numpy as jnp
import numpy as np
from jax import lax
from jax.experimental import pallas as pl
from jax.experimental.pallas import tpu as pltpu

# ---- problem sizes (small, consistent with the module) ----------------------
T, B = 8, 2
OBS_DIM = 6          # x[..., :-1] features; raw input has OBS_DIM + 1
OBS_PAD = 8
RNN_SIZE = 32
FC_SIZE = 32
ACTION_DIM = 4
H = RNN_SIZE
FC = FC_SIZE

VALUE_NOISE_STD = 0.0   # must stay 0 for the noise elision to be valid
REVERSE_VALUE = False   # must stay False for the t-branch elision to be valid

# ---- bf16 weight-slab layout: one (R_SLAB, 128) buffer, rows 16-aligned -----
ROW_WIH = 0        # ( 8,128) LSTM W_ih^T (i/f/o cols pre-scaled by 0.5), rows 0:OBS_DIM
ROW_WHH = 16       # (32,128) LSTM W_hh^T (i/f/o cols pre-scaled by 0.5)
ROW_LB = 48        # ( 1,128) LSTM bias b_ih+b_hh (i/f/o cols pre-scaled by 0.5)
ROW_CW1B = 64      # (32, 32) critic.l1 weight^T, b-part
ROW_CW1U = 96      # ( 1, 32) critic.l1 weight^T, u-part row 0 (u2=[1,0])
ROW_CB1 = 112      # ( 1, 32) critic.l1 bias
ROW_CW2 = 128      # (32, 32) critic.l2 weight^T
ROW_CB2 = 160      # ( 1, 32) critic.l2 bias
ROW_CW3A = 176     # (32, 32) (critic.l3 w^T @ actor.l1 v-row) / 5
ROW_AW1B = 208     # (32, 32) actor.l1 weight^T, b-part
ROW_AB1 = 240      # ( 1, 32) actor.l1 bias
ROW_AW2 = 256      # (32, 32) actor.l2 weight^T
ROW_AB2 = 288      # ( 1, 32) actor.l2 bias
ROW_AW3 = 304      # (32,128) actor.l3 weight^T, cols 0:ACTION_DIM (lane-dense out)
ROW_AB3 = 336      # ( 1,128) actor.l3 bias
R_SLAB = 352

BF16 = jnp.bfloat16
F32 = jnp.float32


# ============================ fused Actor kernel ==============================
def actor_kernel(x_ref, hc_ref, w_ref, act_ref, hcout_ref, b_buf):
    N = x_ref.shape[0]              # T * B rows, time-major
    B_ = hc_ref.shape[0] // 2
    T_ = N // B_

    # ------------------------- LSTM (critic.rnn1) ----------------------------
    # Input projection for all time steps in one bf16 matmul; gate bias folded in.
    x_bf = x_ref[...].astype(BF16)
    wih = w_ref[ROW_WIH:ROW_WIH + OBS_PAD, :]                     # (8,128) bf16
    lb = w_ref[ROW_LB:ROW_LB + 1, :].astype(F32)                  # (1,128)
    gx = jnp.dot(x_bf, wih, preferred_element_type=F32) + lb      # (N,128) f32

    whh = w_ref[ROW_WHH:ROW_WHH + H, :]                           # (32,128) bf16, hoisted

    # sigmoid(x) = 0.5*tanh(x/2)+0.5 ; i/f/o pre-activations were halved host-side,
    # so one full-vreg tanh + one lane-masked FMA recovers all four gates.
    lane = lax.broadcasted_iota(jnp.int32, (1, 128), 1)
    is_g = (lane >= 2 * H) & (lane < 3 * H)
    g_scale = jnp.where(is_g, 1.0, 0.5).astype(F32)               # (1,128)
    g_off = jnp.where(is_g, 0.0, 0.5).astype(F32)

    h = hc_ref[0:B_, :]                                           # (B,32) f32
    c = hc_ref[B_:2 * B_, :]
    for t in range(T_):                                           # statically unrolled (T=8)
        pre = gx[t * B_:(t + 1) * B_, :] + jnp.dot(
            h.astype(BF16), whh, preferred_element_type=F32)      # (B,128) f32
        ga = jnp.tanh(pre) * g_scale + g_off                      # 1 EUP push, full vreg
        i = ga[:, 0 * H:1 * H]                                    # PyTorch order i,f,g,o
        f = ga[:, 1 * H:2 * H]
        g = ga[:, 2 * H:3 * H]
        o = ga[:, 3 * H:4 * H]
        c = f * c + i * g
        h = o * jnp.tanh(c)
        b_buf[t * B_:(t + 1) * B_, :] = h                         # VMEM scratch, f32
    hcout_ref[...] = jnp.concatenate([h, c], axis=0)              # merged (2B,H) store

    b_bf = b_buf[...].astype(BF16)                                # (N,32)

    # -------------------- critic value-diff head (batched) -------------------
    # base = l1([b, u=0]); the u=[1,0] branch adds the u-row of l1's weight.
    cw1b = w_ref[ROW_CW1B:ROW_CW1B + H, 0:FC]                     # (32,32) bf16
    cb1 = w_ref[ROW_CB1:ROW_CB1 + 1, 0:FC].astype(F32)
    u_row = w_ref[ROW_CW1U:ROW_CW1U + 1, 0:FC].astype(F32)
    base = jnp.dot(b_bf, cw1b, preferred_element_type=F32) + cb1  # (N,32) f32
    stacked = jnp.concatenate([base, base + u_row], axis=0)       # (2N,32)
    h1 = jnp.maximum(stacked, 0.0).astype(BF16)
    cw2 = w_ref[ROW_CW2:ROW_CW2 + FC, 0:FC]
    cb2 = w_ref[ROW_CB2:ROW_CB2 + 1, 0:FC].astype(F32)
    h2 = jnp.maximum(jnp.dot(h1, cw2, preferred_element_type=F32) + cb2, 0.0)
    diff = (h2[:N, :] - h2[N:, :]).astype(BF16)                   # (N,32)
    # v * actor_l1_v_column == diff @ (cw3 @ aw1_v / 5); critic.l3 bias cancels.
    # TODO(synk): value-noise (randn_like) path skipped; value_noise_std == 0.
    cw3a = w_ref[ROW_CW3A:ROW_CW3A + FC, 0:FC]
    vproj = jnp.dot(diff, cw3a, preferred_element_type=F32)       # (N,32) f32

    # -------------------------------- actor MLP ------------------------------
    aw1b = w_ref[ROW_AW1B:ROW_AW1B + H, 0:FC]
    ab1 = w_ref[ROW_AB1:ROW_AB1 + 1, 0:FC].astype(F32)
    a1 = jnp.maximum(jnp.dot(b_bf, aw1b, preferred_element_type=F32)
                     + vproj + ab1, 0.0).astype(BF16)
    aw2 = w_ref[ROW_AW2:ROW_AW2 + FC, 0:FC]
    ab2 = w_ref[ROW_AB2:ROW_AB2 + 1, 0:FC].astype(F32)
    a2 = jnp.maximum(jnp.dot(a1, aw2, preferred_element_type=F32) + ab2,
                     0.0).astype(BF16)
    aw3 = w_ref[ROW_AW3:ROW_AW3 + FC, :]                          # (32,128) -> lane-dense out
    ab3 = w_ref[ROW_AB3:ROW_AB3 + 1, :].astype(F32)
    act_ref[...] = jnp.tanh(
        jnp.dot(a2, aw3, preferred_element_type=F32) + ab3)       # (N,128) f32


def actor_pallas(x_flat_pad, hc0, w_slab):
    N = x_flat_pad.shape[0]
    B2 = hc0.shape[0]
    vspec = pl.BlockSpec(memory_space=pltpu.MemorySpace.VMEM)
    return pl.pallas_call(
        actor_kernel,
        out_shape=(
            jax.ShapeDtypeStruct((N, 128), jnp.float32),   # action (lane-padded)
            jax.ShapeDtypeStruct((B2, H), jnp.float32),    # h_n || c_n
        ),
        in_specs=[vspec, vspec, vspec],
        out_specs=(vspec, vspec),
        scratch_shapes=[pltpu.VMEM((N, H), jnp.float32)],  # hidden-state sequence b
    )(x_flat_pad, hc0, w_slab)


# ================================ parameters =================================
def init_params(key):
    ks = jax.random.split(key, 12)
    std = 0.1
    # critic.rnn1 (LSTM(OBS_DIM, RNN_SIZE)) -- stored transposed for x @ W
    wih = (jax.random.normal(ks[0], (OBS_DIM, 4 * H)) * std).astype(jnp.float32)
    whh = (jax.random.normal(ks[1], (H, 4 * H)) * std).astype(jnp.float32)
    lstm_bias = (jax.random.normal(ks[2], (1, 4 * H)) * std).astype(jnp.float32)  # b_ih+b_hh
    # critic.l1/l2/l3 : (H+2)->FC, FC->FC, FC->1   (critic is external; synthetic)
    cw1 = (jax.random.normal(ks[3], (H + 2, FC_SIZE)) * std).astype(jnp.float32)
    cb1 = (jax.random.normal(ks[4], (1, FC_SIZE)) * std).astype(jnp.float32)
    cw2 = (jax.random.normal(ks[5], (FC_SIZE, FC_SIZE)) * std).astype(jnp.float32)
    cb2 = (jax.random.normal(ks[6], (1, FC_SIZE)) * std).astype(jnp.float32)
    cw3 = (jax.random.normal(ks[7], (FC_SIZE, 1)) * std).astype(jnp.float32)
    cb3 = (jax.random.normal(ks[8], (1, 1)) * std).astype(jnp.float32)
    # actor.l1/l2/l3 : (H+1)->FC, FC->FC, FC->ACTION_DIM  (normal(0,0.1), bias 0)
    aw1 = (jax.random.normal(ks[9], (H + 1, FC_SIZE)) * std).astype(jnp.float32)
    aw2 = (jax.random.normal(ks[10], (FC_SIZE, FC_SIZE)) * std).astype(jnp.float32)
    aw3 = (jax.random.normal(ks[11], (FC_SIZE, ACTION_DIM)) * std).astype(jnp.float32)
    ab1 = jnp.zeros((1, FC_SIZE), jnp.float32)
    ab2 = jnp.zeros((1, FC_SIZE), jnp.float32)
    ab3 = jnp.zeros((1, ACTION_DIM), jnp.float32)
    return dict(wih=wih, whh=whh, lstm_bias=lstm_bias,
                cw1=cw1, cb1=cb1, cw2=cw2, cb2=cb2, cw3=cw3, cb3=cb3,
                aw1=aw1, ab1=ab1, aw2=aw2, ab2=ab2, aw3=aw3, ab3=ab3)


def pack_weights(p):
    """Coalesce every parameter into one lane-dense (R_SLAB, 128) bf16 slab."""
    assert VALUE_NOISE_STD == 0.0 and REVERSE_VALUE is False, \
        "kernel elides the value-noise and reverse_value branches"
    slab = np.zeros((R_SLAB, 128), np.float32)

    def put(row, a):
        a = np.asarray(a, np.float32)
        slab[row:row + a.shape[0], :a.shape[1]] = a

    # Pre-scale i/f/o gate columns by 0.5 (sigmoid(x) = 0.5*tanh(x/2)+0.5 in-kernel).
    gate_scale = np.full((1, 4 * H), 0.5, np.float32)
    gate_scale[:, 2 * H:3 * H] = 1.0                               # g-gate keeps tanh(x)
    put(ROW_WIH, np.asarray(p["wih"], np.float32) * gate_scale)    # rows 6:8 stay zero
    put(ROW_WHH, np.asarray(p["whh"], np.float32) * gate_scale)
    put(ROW_LB, np.asarray(p["lstm_bias"], np.float32) * gate_scale)

    put(ROW_CW1B, p["cw1"][:H])                 # b-part of critic.l1
    put(ROW_CW1U, p["cw1"][H:H + 1])            # u-part row 0 (u2 = [1, 0])
    put(ROW_CB1, p["cb1"])
    put(ROW_CW2, p["cw2"])
    put(ROW_CB2, p["cb2"])
    cw3a = (np.asarray(p["cw3"], np.float32)
            @ np.asarray(p["aw1"][H:H + 1], np.float32)) / 5.0     # (FC, FC)
    put(ROW_CW3A, cw3a)                         # critic.l3 bias cancels in the diff
    put(ROW_AW1B, p["aw1"][:H])
    put(ROW_AB1, p["ab1"])
    put(ROW_AW2, p["aw2"])
    put(ROW_AB2, p["ab2"])
    put(ROW_AW3, p["aw3"])                      # (32, 4) in cols 0:4
    put(ROW_AB3, p["ab3"])
    return jnp.asarray(slab).astype(jnp.bfloat16)


# ============================== forward (wrapper) ============================
def actor_forward(x, hidden_in, params, return_hidden=True):
    # t = x[..., -1:] is only used when reverse_value=True (it is False) -> unused.
    x_obs = x[..., :-1]
    T_, B_, D = x_obs.shape
    x_flat = jnp.pad(x_obs.reshape(T_ * B_, D), ((0, 0), (0, OBS_PAD - D)))
    if hidden_in is None:
        hc0 = jnp.zeros((2 * B_, H), jnp.float32)
    else:
        h0, c0 = hidden_in
        hc0 = jnp.concatenate([h0, c0], axis=0)
    act128, hc = actor_pallas(x_flat, hc0, params["w_slab"])
    act = act128[:, :ACTION_DIM].reshape(T_, B_, ACTION_DIM)
    h_n, c_n = hc[:B_], hc[B_:]
    if return_hidden:
        return act, (h_n, c_n)
    return act


# ============================== pure-JAX reference ===========================
def reference_forward(x, params):
    x_obs = x[..., :-1]
    h0 = jnp.zeros((B, H), jnp.float32)
    c0 = jnp.zeros((B, H), jnp.float32)

    def step(carry, xt):
        h, c = carry
        gates = xt @ params["wih"] + h @ params["whh"] + params["lstm_bias"]
        i = jax.nn.sigmoid(gates[:, :H])
        f = jax.nn.sigmoid(gates[:, H:2 * H])
        g = jnp.tanh(gates[:, 2 * H:3 * H])
        o = jax.nn.sigmoid(gates[:, 3 * H:4 * H])
        c = f * c + i * g
        h = o * jnp.tanh(c)
        return (h, c), h

    (h_n, c_n), b = lax.scan(step, (h0, c0), x_obs)
    bf = b.reshape(T * B, H)
    u1 = jnp.zeros((T * B, 2), jnp.float32)
    u2 = u1.at[:, 0].set(1.0)

    def critic_v(u):
        h1 = jnp.maximum(jnp.concatenate([bf, u], -1) @ params["cw1"] + params["cb1"], 0.0)
        h2 = jnp.maximum(h1 @ params["cw2"] + params["cb2"], 0.0)
        return h2 @ params["cw3"] + params["cb3"]

    v = (critic_v(u1) - critic_v(u2)) / 5.0
    xa = jnp.concatenate([bf, v], -1)
    a = jnp.maximum(xa @ params["aw1"] + params["ab1"], 0.0)
    a = jnp.maximum(a @ params["aw2"] + params["ab2"], 0.0)
    out = jnp.tanh(a @ params["aw3"] + params["ab3"])
    return out.reshape(T, B, ACTION_DIM), (h_n, c_n)


# ==================================== main ===================================
if __name__ == "__main__":
    key = jax.random.PRNGKey(0)
    k_x, k_p = jax.random.split(key)
    params = init_params(k_p)
    params["w_slab"] = pack_weights(params)
    x = jax.random.normal(k_x, (T, B, OBS_DIM + 1), dtype=jnp.float32)

    act, (h_n, c_n) = actor_forward(x, None, params, return_hidden=True)
    act = jax.block_until_ready(act)
    h_n = jax.block_until_ready(h_n)
    c_n = jax.block_until_ready(c_n)

    ref_act, (ref_h, ref_c) = reference_forward(x, params)
    # tolerant compare: kernel uses bf16 MXU operands (f32 accumulate) vs f32 reference
    np.testing.assert_allclose(np.asarray(act), np.asarray(ref_act), atol=2e-2, rtol=2e-2)
    np.testing.assert_allclose(np.asarray(h_n), np.asarray(ref_h), atol=2e-2, rtol=2e-2)
    np.testing.assert_allclose(np.asarray(c_n), np.asarray(ref_c), atol=2e-2, rtol=2e-2)

    assert act.shape == (T, B, ACTION_DIM)
    print("KERNEL_OK")
</pallas_src>

<mosaic_0001>
module attributes {stable_mosaic.version = 11 : i64} {
  func.func @actor_kernel(%arg0: memref<16x8xf32, #tpu.memory_space<vmem>>, %arg1: memref<4x32xf32, #tpu.memory_space<vmem>>, %arg2: memref<352x128xbf16, #tpu.memory_space<vmem>>, %arg3: memref<16x128xf32, #tpu.memory_space<vmem>>, %arg4: memref<4x32xf32, #tpu.memory_space<vmem>>, %arg5: memref<16x32xf32, #tpu.memory_space<vmem>>) attributes {dimension_semantics = [], scalar_prefetch = 0 : i64, scratch_operands = 1 : i64, tpu.core_type = #tpu.core_type<tc>} {
    %c0 = arith.constant 0 : index
    %c0_0 = arith.constant 0 : index
    %0 = vector.load %arg0[%c0, %c0_0] : memref<16x8xf32, #tpu.memory_space<vmem>>, vector<16x8xf32>
    %1 = arith.truncf %0 : vector<16x8xf32> to vector<16x8xbf16>
    %c0_1 = arith.constant 0 : index
    %c0_2 = arith.constant 0 : index
    %2 = vector.load %arg2[%c0_1, %c0_2] : memref<352x128xbf16, #tpu.memory_space<vmem>>, vector<8x128xbf16>
    %c48 = arith.constant 48 : index
    %c0_3 = arith.constant 0 : index
    %3 = vector.load %arg2[%c48, %c0_3] : memref<352x128xbf16, #tpu.memory_space<vmem>>, vector<1x128xbf16>
    %4 = arith.extf %3 : vector<1x128xbf16> to vector<1x128xf32>
    %cst = arith.constant dense<0.000000e+00> : vector<16x128xf32>
    %5 = tpu.matmul %1, %2, %cst {dimension_numbers = #tpu.dot_dimension_numbers<[1], [0], [0], [1], [0, 0, 1, 1], [], []>} : vector<16x8xbf16>, vector<8x128xbf16>, vector<16x128xf32> -> vector<16x128xf32>
    %6 = vector.broadcast %4 : vector<1x128xf32> to vector<16x128xf32>
    %7 = arith.addf %5, %6 : vector<16x128xf32>
    %c16 = arith.constant 16 : index
    %c0_4 = arith.constant 0 : index
    %8 = vector.load %arg2[%c16, %c0_4] : memref<352x128xbf16, #tpu.memory_space<vmem>>, vector<32x128xbf16>
    %9 = tpu.iota {dimensions = array<i32: 1>} : vector<1x128xi32>
    %c64_i32 = arith.constant 64 : i32
    %10 = vector.broadcast %c64_i32 : i32 to vector<1x128xi32>
    %11 = arith.cmpi sge, %9, %10 : vector<1x128xi32>
    %c96_i32 = arith.constant 96 : i32
    %12 = vector.broadcast %c96_i32 : i32 to vector<1x128xi32>
    %13 = arith.cmpi slt, %9, %12 : vector<1x128xi32>
    %14 = arith.andi %11, %13 : vector<1x128xi1>
    %cst_5 = arith.constant 1.000000e+00 : f32
    %cst_6 = arith.constant 5.000000e-01 : f32
    %15 = vector.broadcast %cst_5 : f32 to vector<1x128xf32>
    %16 = vector.broadcast %cst_6 : f32 to vector<1x128xf32>
    %17 = arith.select %14, %15, %16 : vector<1x128xi1>, vector<1x128xf32>
    %cst_7 = arith.constant 0.000000e+00 : f32
    %cst_8 = arith.constant 5.000000e-01 : f32
    %18 = vector.broadcast %cst_7 : f32 to vector<1x128xf32>
    %19 = vector.broadcast %cst_8 : f32 to vector<1x128xf32>
    %20 = arith.select %14, %18, %19 : vector<1x128xi1>, vector<1x128xf32>
    %c0_9 = arith.constant 0 : index
    %c0_10 = arith.constant 0 : index
    %21 = vector.load %arg1[%c0_9, %c0_10] : memref<4x32xf32, #tpu.memory_space<vmem>>, vector<2x32xf32>
    %c2 = arith.constant 2 : index
    %c0_11 = arith.constant 0 : index
    %22 = vector.load %arg1[%c2, %c0_11] : memref<4x32xf32, #tpu.memory_space<vmem>>, vector<2x32xf32>
    %23 = vector.extract_strided_slice %7 {offsets = [0, 0], sizes = [2, 128], strides = [1, 1]} : vector<16x128xf32> to vector<2x128xf32>
    %24 = arith.truncf %21 : vector<2x32xf32> to vector<2x32xbf16>
    %cst_12 = arith.constant dense<0.000000e+00> : vector<2x128xf32>
    %25 = tpu.matmul %24, %8, %cst_12 {dimension_numbers = #tpu.dot_dimension_numbers<[1], [0], [0], [1], [0, 0, 1, 1], [], []>} : vector<2x32xbf16>, vector<32x128xbf16>, vector<2x128xf32> -> vector<2x128xf32>
    %26 = arith.addf %23, %25 : vector<2x128xf32>
    %27 = math.tanh %26 : vector<2x128xf32>
    %28 = vector.broadcast %17 : vector<1x128xf32> to vector<2x128xf32>
    %29 = arith.mulf %27, %28 : vector<2x128xf32>
    %30 = vector.broadcast %20 : vector<1x128xf32> to vector<2x128xf32>
    %31 = arith.addf %29, %30 : vector<2x128xf32>
    %32 = vector.extract_strided_slice %31 {offsets = [0, 0], sizes = [2, 32], strides = [1, 1]} : vector<2x128xf32> to vector<2x32xf32>
    %33 = vector.extract_strided_slice %31 {offsets = [0, 32], sizes = [2, 32], strides = [1, 1]} : vector<2x128xf32> to vector<2x32xf32>
    %34 = vector.extract_strided_slice %31 {offsets = [0, 64], sizes = [2, 32], strides = [1, 1]} : vector<2x128xf32> to vector<2x32xf32>
    %35 = vector.extract_strided_slice %31 {offsets = [0, 96], sizes = [2, 32], strides = [1, 1]} : vector<2x128xf32> to vector<2x32xf32>
    %36 = arith.mulf %33, %22 : vector<2x32xf32>
    %37 = arith.mulf %32, %34 : vector<2x32xf32>
    %38 = arith.addf %36, %37 : vector<2x32xf32>
    %39 = math.tanh %38 : vector<2x32xf32>
    %40 = arith.mulf %35, %39 : vector<2x32xf32>
    %c0_13 = arith.constant 0 : index
    %c0_14 = arith.constant 0 : index
    %41 = vector.load %arg5[%c0_13, %c0_14] : memref<16x32xf32, #tpu.memory_space<vmem>>, vector<2x32xf32>
    tpu.vector_store %arg5[%c0_13, %c0_14], %40 {strides = array<i32>} : memref<16x32xf32, #tpu.memory_space<vmem>>, vector<2x32xf32>,
    %42 = vector.extract_strided_slice %7 {offsets = [2, 0], sizes = [2, 128], strides = [1, 1]} : vector<16x128xf32> to vector<2x128xf32>
    %43 = arith.truncf %40 : vector<2x32xf32> to vector<2x32xbf16>
    %cst_15 = arith.constant dense<0.000000e+00> : vector<2x128xf32>
    %44 = tpu.matmul %43, %8, %cst_15 {dimension_numbers = #tpu.dot_dimension_numbers<[1], [0], [0], [1], [0, 0, 1, 1], [], []>} : vector<2x32xbf16>, vector<32x128xbf16>, vector<2x128xf32> -> vector<2x128xf32>
    %45 = arith.addf %42, %44 : vector<2x128xf32>
    %46 = math.tanh %45 : vector<2x128xf32>
    %47 = vector.broadcast %17 : vector<1x128xf32> to vector<2x128xf32>
    %48 = arith.mulf %46, %47 : vector<2x128xf32>
    %49 = vector.broadcast %20 : vector<1x128xf32> to vector<2x128xf32>
    %50 = arith.addf %48, %49 : vector<2x128xf32>
    %51 = vector.extract_strided_slice %50 {offsets = [0, 0], sizes = [2, 32], strides = [1, 1]} : vector<2x128xf32> to vector<2x32xf32>
    %52 = vector.extract_strided_slice %50 {offsets = [0, 32], sizes = [2, 32], strides = [1, 1]} : vector<2x128xf32> to vector<2x32xf32>
    %53 = vector.extract_strided_slice %50 {offsets = [0, 64], sizes = [2, 32], strides = [1, 1]} : vector<2x128xf32> to vector<2x32xf32>
    %54 = vector.extract_strided_slice %50 {offsets = [0, 96], sizes = [2, 32], strides = [1, 1]} : vector<2x128xf32> to vector<2x32xf32>
    %55 = arith.mulf %52, %38 : vector<2x32xf32>
    %56 = arith.mulf %51, %53 : vector<2x32xf32>
    %57 = arith.addf %55, %56 : vector<2x32xf32>
    %58 = math.tanh %57 : vector<2x32xf32>
    %59 = arith.mulf %54, %58 : vector<2x32xf32>
    %c2_16 = arith.constant 2 : index
    %c0_17 = arith.constant 0 : index
    %60 = vector.load %arg5[%c2_16, %c0_17] : memref<16x32xf32, #tpu.memory_space<vmem>>, vector<2x32xf32>
    tpu.vector_store %arg5[%c2_16, %c0_17], %59 {strides = array<i32>} : memref<16x32xf32, #tpu.memory_space<vmem>>, vector<2x32xf32>,
    %61 = vector.extract_strided_slice %7 {offsets = [4, 0], sizes = [2, 128], strides = [1, 1]} : vector<16x128xf32> to vector<2x128xf32>
    %62 = arith.truncf %59 : vector<2x32xf32> to vector<2x32xbf16>
    %cst_18 = arith.constant dense<0.000000e+00> : vector<2x128xf32>
    %63 = tpu.matmul %62, %8, %cst_18 {dimension_numbers = #tpu.dot_dimension_numbers<[1], [0], [0], [1], [0, 0, 1, 1], [], []>} : vector<2x32xbf16>, vector<32x128xbf16>, vector<2x128xf32> -> vector<2x128xf32>
    %64 = arith.addf %61, %63 : vector<2x128xf32>
    %65 = math.tanh %64 : vector<2x128xf32>
    %66 = vector.broadcast %17 : vector<1x128xf32> to vector<2x128xf32>
    %67 = arith.mulf %65, %66 : vector<2x128xf32>
    %68 = vector.broadcast %20 : vector<1x128xf32> to vector<2x128xf32>
    %69 = arith.addf %67, %68 : vector<2x128xf32>
    %70 = vector.extract_strided_slice %69 {offsets = [0, 0], sizes = [2, 32], strides = [1, 1]} : vector<2x128xf32> to vector<2x32xf32>
    %71 = vector.extract_strided_slice %69 {offsets = [0, 32], sizes = [2, 32], strides = [1, 1]} : vector<2x128xf32> to vector<2x32xf32>
    %72 = vector.extract_strided_slice %69 {offsets = [0, 64], sizes = [2, 32], strides = [1, 1]} : vector<2x128xf32> to vector<2x32xf32>
    %73 = vector.extract_strided_slice %69 {offsets = [0, 96], sizes = [2, 32], strides = [1, 1]} : vector<2x128xf32> to vector<2x32xf32>
    %74 = arith.mulf %71, %57 : vector<2x32xf32>
    %75 = arith.mulf %70, %72 : vector<2x32xf32>
    %76 = arith.addf %74, %75 : vector<2x32xf32>
    %77 = math.tanh %76 : vector<2x32xf32>
    %78 = arith.mulf %73, %77 : vector<2x32xf32>
    %c4 = arith.constant 4 : index
    %c0_19 = arith.constant 0 : index
    %79 = vector.load %arg5[%c4, %c0_19] : memref<16x32xf32, #tpu.memory_space<vmem>>, vector<2x32xf32>
    tpu.vector_store %arg5[%c4, %c0_19], %78 {strides = array<i32>} : memref<16x32xf32, #tpu.memory_space<vmem>>, vector<2x32xf32>,
    %80 = vector.extract_strided_slice %7 {offsets = [6, 0], sizes = [2, 128], strides = [1, 1]} : vector<16x128xf32> to vector<2x128xf32>
    %81 = arith.truncf %78 : vector<2x32xf32> to vector<2x32xbf16>
    %cst_20 = arith.constant dense<0.000000e+00> : vector<2x128xf32>
    %82 = tpu.matmul %81, %8, %cst_20 {dimension_numbers = #tpu.dot_dimension_numbers<[1], [0], [0], [1], [0, 0, 1, 1], [], []>} : vector<2x32xbf16>, vector<32x128xbf16>, vector<2x128xf32> -> vector<2x128xf32>
    %83 = arith.addf %80, %82 : vector<2x128xf32>
    %84 = math.tanh %83 : vector<2x128xf32>
    %85 = vector.broadcast %17 : vector<1x128xf32> to vector<2x128xf32>
    %86 = arith.mulf %84, %85 : vector<2x128xf32>
    %87 = vector.broadcast %20 : vector<1x128xf32> to vector<2x128xf32>
    %88 = arith.addf %86, %87 : vector<2x128xf32>
    %89 = vector.extract_strided_slice %88 {offsets = [0, 0], sizes = [2, 32], strides = [1, 1]} : vector<2x128xf32> to vector<2x32xf32>
    %90 = vector.extract_strided_slice %88 {offsets = [0, 32], sizes = [2, 32], strides = [1, 1]} : vector<2x128xf32> to vector<2x32xf32>
    %91 = vector.extract_strided_slice %88 {offsets = [0, 64], sizes = [2, 32], strides = [1, 1]} : vector<2x128xf32> to vector<2x32xf32>
    %92 = vector.extract_strided_slice %88 {offsets = [0, 96], sizes = [2, 32], strides = [1, 1]} : vector<2x128xf32> to vector<2x32xf32>
    %93 = arith.mulf %90, %76 : vector<2x32xf32>
    %94 = arith.mulf %89, %91 : vector<2x32xf32>
    %95 = arith.addf %93, %94 : vector<2x32xf32>
    %96 = math.tanh %95 : vector<2x32xf32>
    %97 = arith.mulf %92, %96 : vector<2x32xf32>
    %c6 = arith.constant 6 : index
    %c0_21 = arith.constant 0 : index
    %98 = vector.load %arg5[%c6, %c0_21] : memref<16x32xf32, #tpu.memory_space<vmem>>, vector<2x32xf32>
    tpu.vector_store %arg5[%c6, %c0_21], %97 {strides = array<i32>} : memref<16x32xf32, #tpu.memory_space<vmem>>, vector<2x32xf32>,
    %99 = vector.extract_strided_slice %7 {offsets = [8, 0], sizes = [2, 128], strides = [1, 1]} : vector<16x128xf32> to vector<2x128xf32>
    %100 = arith.truncf %97 : vector<2x32xf32> to vector<2x32xbf16>
    %cst_22 = arith.constant dense<0.000000e+00> : vector<2x128xf32>
    %101 = tpu.matmul %100, %8, %cst_22 {dimension_numbers = #tpu.dot_dimension_numbers<[1], [0], [0], [1], [0, 0, 1, 1], [], []>} : vector<2x32xbf16>, vector<32x128xbf16>, vector<2x128xf32> -> vector<2x128xf32>
    %102 = arith.addf %99, %101 : vector<2x128xf32>
    %103 = math.tanh %102 : vector<2x128xf32>
    %104 = vector.broadcast %17 : vector<1x128xf32> to vector<2x128xf32>
    %105 = arith.mulf %103, %104 : vector<2x128xf32>
    %106 = vector.broadcast %20 : vector<1x128xf32> to vector<2x128xf32>
    %107 = arith.addf %105, %106 : vector<2x128xf32>
    %108 = vector.extract_strided_slice %107 {offsets = [0, 0], sizes = [2, 32], strides = [1, 1]} : vector<2x128xf32> to vector<2x32xf32>
    %109 = vector.extract_strided_slice %107 {offsets = [0, 32], sizes = [2, 32], strides = [1, 1]} : vector<2x128xf32> to vector<2x32xf32>
    %110 = vector.extract_strided_slice %107 {offsets = [0, 64], sizes = [2, 32], strides = [1, 1]} : vector<2x128xf32> to vector<2x32xf32>
    %111 = vector.extract_strided_slice %107 {offsets = [0, 96], sizes = [2, 32], strides = [1, 1]} : vector<2x128xf32> to vector<2x32xf32>
    %112 = arith.mulf %109, %95 : vector<2x32xf32>
    %113 = arith.mulf %108, %110 : vector<2x32xf32>
    %114 = arith.addf %112, %113 : vector<2x32xf32>
    %115 = math.tanh %114 : vector<2x32xf32>
    %116 = arith.mulf %111, %115 : vector<2x32xf32>
    %c8 = arith.constant 8 : index
    %c0_23 = arith.constant 0 : index
    %117 = vector.load %arg5[%c8, %c0_23] : memref<16x32xf32, #tpu.memory_space<vmem>>, vector<2x32xf32>
    tpu.vector_store %arg5[%c8, %c0_23], %116 {strides = array<i32>} : memref<16x32xf32, #tpu.memory_space<vmem>>, vector<2x32xf32>,
    %118 = vector.extract_strided_slice %7 {offsets = [10, 0], sizes = [2, 128], strides = [1, 1]} : vector<16x128xf32> to vector<2x128xf32>
    %119 = arith.truncf %116 : vector<2x32xf32> to vector<2x32xbf16>
    %cst_24 = arith.constant dense<0.000000e+00> : vector<2x128xf32>
    %120 = tpu.matmul %119, %8, %cst_24 {dimension_numbers = #tpu.dot_dimension_numbers<[1], [0], [0], [1], [0, 0, 1, 1], [], []>} : vector<2x32xbf16>, vector<32x128xbf16>, vector<2x128xf32> -> vector<2x128xf32>
    %121 = arith.addf %118, %120 : vector<2x128xf32>
    %122 = math.tanh %121 : vector<2x128xf32>
    %123 = vector.broadcast %17 : vector<1x128xf32> to vector<2x128xf32>
    %124 = arith.mulf %122, %123 : vector<2x128xf32>
    %125 = vector.broadcast %20 : vector<1x128xf32> to vector<2x128xf32>
    %126 = arith.addf %124, %125 : vector<2x128xf32>
    %127 = vector.extract_strided_slice %126 {offsets = [0, 0], sizes = [2, 32], strides = [1, 1]} : vector<2x128xf32> to vector<2x32xf32>
    %128 = vector.extract_strided_slice %126 {offsets = [0, 32], sizes = [2, 32], strides = [1, 1]} : vector<2x128xf32> to vector<2x32xf32>
    %129 = vector.extract_strided_slice %126 {offsets = [0, 64], sizes = [2, 32], strides = [1, 1]} : vector<2x128xf32> to vector<2x32xf32>
    %130 = vector.extract_strided_slice %126 {offsets = [0, 96], sizes = [2, 32], strides = [1, 1]} : vector<2x128xf32> to vector<2x32xf32>
    %131 = arith.mulf %128, %114 : vector<2x32xf32>
    %132 = arith.mulf %127, %129 : vector<2x32xf32>
    %133 = arith.addf %131, %132 : vector<2x32xf32>
    %134 = math.tanh %133 : vector<2x32xf32>
    %135 = arith.mulf %130, %134 : vector<2x32xf32>
    %c10 = arith.constant 10 : index
    %c0_25 = arith.constant 0 : index
    %136 = vector.load %arg5[%c10, %c0_25] : memref<16x32xf32, #tpu.memory_space<vmem>>, vector<2x32xf32>
    tpu.vector_store %arg5[%c10, %c0_25], %135 {strides = array<i32>} : memref<16x32xf32, #tpu.memory_space<vmem>>, vector<2x32xf32>,
    %137 = vector.extract_strided_slice %7 {offsets = [12, 0], sizes = [2, 128], strides = [1, 1]} : vector<16x128xf32> to vector<2x128xf32>
    %138 = arith.truncf %135 : vector<2x32xf32> to vector<2x32xbf16>
    %cst_26 = arith.constant dense<0.000000e+00> : vector<2x128xf32>
    %139 = tpu.matmul %138, %8, %cst_26 {dimension_numbers = #tpu.dot_dimension_numbers<[1], [0], [0], [1], [0, 0, 1, 1], [], []>} : vector<2x32xbf16>, vector<32x128xbf16>, vector<2x128xf32> -> vector<2x128xf32>
    %140 = arith.addf %137, %139 : vector<2x128xf32>
    %141 = math.tanh %140 : vector<2x128xf32>
    %142 = vector.broadcast %17 : vector<1x128xf32> to vector<2x128xf32>
    %143 = arith.mulf %141, %142 : vector<2x128xf32>
    %144 = vector.broadcast %20 : vector<1x128xf32> to vector<2x128xf32>
    %145 = arith.addf %143, %144 : vector<2x128xf32>
    %146 = vector.extract_strided_slice %145 {offsets = [0, 0], sizes = [2, 32], strides = [1, 1]} : vector<2x128xf32> to vector<2x32xf32>
    %147 = vector.extract_strided_slice %145 {offsets = [0, 32], sizes = [2, 32], strides = [1, 1]} : vector<2x128xf32> to vector<2x32xf32>
    %148 = vector.extract_strided_slice %145 {offsets = [0, 64], sizes = [2, 32], strides = [1, 1]} : vector<2x128xf32> to vector<2x32xf32>
    %149 = vector.extract_strided_slice %145 {offsets = [0, 96], sizes = [2, 32], strides = [1, 1]} : vector<2x128xf32> to vector<2x32xf32>
    %150 = arith.mulf %147, %133 : vector<2x32xf32>
    %151 = arith.mulf %146, %148 : vector<2x32xf32>
    %152 = arith.addf %150, %151 : vector<2x32xf32>
    %153 = math.tanh %152 : vector<2x32xf32>
    %154 = arith.mulf %149, %153 : vector<2x32xf32>
    %c12 = arith.constant 12 : index
    %c0_27 = arith.constant 0 : index
    %155 = vector.load %arg5[%c12, %c0_27] : memref<16x32xf32, #tpu.memory_space<vmem>>, vector<2x32xf32>
    tpu.vector_store %arg5[%c12, %c0_27], %154 {strides = array<i32>} : memref<16x32xf32, #tpu.memory_space<vmem>>, vector<2x32xf32>,
    %156 = vector.extract_strided_slice %7 {offsets = [14, 0], sizes = [2, 128], strides = [1, 1]} : vector<16x128xf32> to vector<2x128xf32>
    %157 = arith.truncf %154 : vector<2x32xf32> to vector<2x32xbf16>
    %cst_28 = arith.constant dense<0.000000e+00> : vector<2x128xf32>
    %158 = tpu.matmul %157, %8, %cst_28 {dimension_numbers = #tpu.dot_dimension_numbers<[1], [0], [0], [1], [0, 0, 1, 1], [], []>} : vector<2x32xbf16>, vector<32x128xbf16>, vector<2x128xf32> -> vector<2x128xf32>
    %159 = arith.addf %156, %158 : vector<2x128xf32>
    %160 = math.tanh %159 : vector<2x128xf32>
    %161 = vector.broadcast %17 : vector<1x128xf32> to vector<2x128xf32>
    %162 = arith.mulf %160, %161 : vector<2x128xf32>
    %163 = vector.broadcast %20 : vector<1x128xf32> to vector<2x128xf32>
    %164 = arith.addf %162, %163 : vector<2x128xf32>
    %165 = vector.extract_strided_slice %164 {offsets = [0, 0], sizes = [2, 32], strides = [1, 1]} : vector<2x128xf32> to vector<2x32xf32>
    %166 = vector.extract_strided_slice %164 {offsets = [0, 32], sizes = [2, 32], strides = [1, 1]} : vector<2x128xf32> to vector<2x32xf32>
    %167 = vector.extract_strided_slice %164 {offsets = [0, 64], sizes = [2, 32], strides = [1, 1]} : vector<2x128xf32> to vector<2x32xf32>
    %168 = vector.extract_strided_slice %164 {offsets = [0, 96], sizes = [2, 32], strides = [1, 1]} : vector<2x128xf32> to vector<2x32xf32>
    %169 = arith.mulf %166, %152 : vector<2x32xf32>
    %170 = arith.mulf %165, %167 : vector<2x32xf32>
    %171 = arith.addf %169, %170 : vector<2x32xf32>
    %172 = math.tanh %171 : vector<2x32xf32>
    %173 = arith.mulf %168, %172 : vector<2x32xf32>
    %c14 = arith.constant 14 : index
    %c0_29 = arith.constant 0 : index
    %174 = vector.load %arg5[%c14, %c0_29] : memref<16x32xf32, #tpu.memory_space<vmem>>, vector<2x32xf32>
    tpu.vector_store %arg5[%c14, %c0_29], %173 {strides = array<i32>} : memref<16x32xf32, #tpu.memory_space<vmem>>, vector<2x32xf32>,
    %175 = tpu.concatenate %173, %171 in 0 : vector<2x32xf32>, vector<2x32xf32> -> vector<4x32xf32>
    %c0_30 = arith.constant 0 : index
    %c0_31 = arith.constant 0 : index
    %176 = vector.load %arg4[%c0_30, %c0_31] : memref<4x32xf32, #tpu.memory_space<vmem>>, vector<4x32xf32>
    tpu.vector_store %arg4[%c0_30, %c0_31], %175 {strides = array<i32>} : memref<4x32xf32, #tpu.memory_space<vmem>>, vector<4x32xf32>,
    %c0_32 = arith.constant 0 : index
    %c0_33 = arith.constant 0 : index
    %177 = vector.load %arg5[%c0_32, %c0_33] : memref<16x32xf32, #tpu.memory_space<vmem>>, vector<16x32xf32>
    %178 = arith.truncf %177 : vector<16x32xf32> to vector<16x32xbf16>
    %c64 = arith.constant 64 : index
    %c0_34 = arith.constant 0 : index
    %179 = vector.load %arg2[%c64, %c0_34] : memref<352x128xbf16, #tpu.memory_space<vmem>>, vector<32x32xbf16>
    %c112 = arith.constant 112 : index
    %c0_35 = arith.constant 0 : index
    %180 = vector.load %arg2[%c112, %c0_35] : memref<352x128xbf16, #tpu.memory_space<vmem>>, vector<1x32xbf16>
    %181 = arith.extf %180 : vector<1x32xbf16> to vector<1x32xf32>
    %c96 = arith.constant 96 : index
    %c0_36 = arith.constant 0 : index
    %182 = vector.load %arg2[%c96, %c0_36] : memref<352x128xbf16, #tpu.memory_space<vmem>>, vector<1x32xbf16>
    %183 = arith.extf %182 : vector<1x32xbf16> to vector<1x32xf32>
    %cst_37 = arith.constant dense<0.000000e+00> : vector<16x32xf32>
    %184 = tpu.matmul %178, %179, %cst_37 {dimension_numbers = #tpu.dot_dimension_numbers<[1], [0], [0], [1], [0, 0, 1, 1], [], []>} : vector<16x32xbf16>, vector<32x32xbf16>, vector<16x32xf32> -> vector<16x32xf32>
    %185 = vector.broadcast %181 : vector<1x32xf32> to vector<16x32xf32>
    %186 = arith.addf %184, %185 : vector<16x32xf32>
    %187 = vector.broadcast %183 : vector<1x32xf32> to vector<16x32xf32>
    %188 = arith.addf %186, %187 : vector<16x32xf32>
    %189 = tpu.concatenate %186, %188 in 0 : vector<16x32xf32>, vector<16x32xf32> -> vector<32x32xf32>
    %cst_38 = arith.constant 0.000000e+00 : f32
    %190 = vector.broadcast %cst_38 : f32 to vector<32x32xf32>
    %191 = arith.maximumf %189, %190 : vector<32x32xf32>
    %192 = arith.truncf %191 : vector<32x32xf32> to vector<32x32xbf16>
    %c128 = arith.constant 128 : index
    %c0_39 = arith.constant 0 : index
    %193 = vector.load %arg2[%c128, %c0_39] : memref<352x128xbf16, #tpu.memory_space<vmem>>, vector<32x32xbf16>
    %c160 = arith.constant 160 : index
    %c0_40 = arith.constant 0 : index
    %194 = vector.load %arg2[%c160, %c0_40] : memref<352x128xbf16, #tpu.memory_space<vmem>>, vector<1x32xbf16>
    %195 = arith.extf %194 : vector<1x32xbf16> to vector<1x32xf32>
    %cst_41 = arith.constant dense<0.000000e+00> : vector<32x32xf32>
    %196 = tpu.matmul %192, %193, %cst_41 {dimension_numbers = #tpu.dot_dimension_numbers<[1], [0], [0], [1], [0, 0, 1, 1], [], []>} : vector<32x32xbf16>, vector<32x32xbf16>, vector<32x32xf32> -> vector<32x32xf32>
    %197 = vector.broadcast %195 : vector<1x32xf32> to vector<32x32xf32>
    %198 = arith.addf %196, %197 : vector<32x32xf32>
    %cst_42 = arith.constant 0.000000e+00 : f32
    %199 = vector.broadcast %cst_42 : f32 to vector<32x32xf32>
    %200 = arith.maximumf %198, %199 : vector<32x32xf32>
    %201 = vector.extract_strided_slice %200 {offsets = [0, 0], sizes = [16, 32], strides = [1, 1]} : vector<32x32xf32> to vector<16x32xf32>
    %202 = vector.extract_strided_slice %200 {offsets = [16, 0], sizes = [16, 32], strides = [1, 1]} : vector<32x32xf32> to vector<16x32xf32>
    %203 = arith.subf %201, %202 : vector<16x32xf32>
    %204 = arith.truncf %203 : vector<16x32xf32> to vector<16x32xbf16>
    %c176 = arith.constant 176 : index
    %c0_43 = arith.constant 0 : index
    %205 = vector.load %arg2[%c176, %c0_43] : memref<352x128xbf16, #tpu.memory_space<vmem>>, vector<32x32xbf16>
    %cst_44 = arith.constant dense<0.000000e+00> : vector<16x32xf32>
    %206 = tpu.matmul %204, %205, %cst_44 {dimension_numbers = #tpu.dot_dimension_numbers<[1], [0], [0], [1], [0, 0, 1, 1], [], []>} : vector<16x32xbf16>, vector<32x32xbf16>, vector<16x32xf32> -> vector<16x32xf32>
    %c208 = arith.constant 208 : index
    %c0_45 = arith.constant 0 : index
    %207 = vector.load %arg2[%c208, %c0_45] : memref<352x128xbf16, #tpu.memory_space<vmem>>, vector<32x32xbf16>
    %c240 = arith.constant 240 : index
    %c0_46 = arith.constant 0 : index
    %208 = vector.load %arg2[%c240, %c0_46] : memref<352x128xbf16, #tpu.memory_space<vmem>>, vector<1x32xbf16>
    %209 = arith.extf %208 : vector<1x32xbf16> to vector<1x32xf32>
    %cst_47 = arith.constant dense<0.000000e+00> : vector<16x32xf32>
    %210 = tpu.matmul %178, %207, %cst_47 {dimension_numbers = #tpu.dot_dimension_numbers<[1], [0], [0], [1], [0, 0, 1, 1], [], []>} : vector<16x32xbf16>, vector<32x32xbf16>, vector<16x32xf32> -> vector<16x32xf32>
    %211 = arith.addf %210, %206 : vector<16x32xf32>
    %212 = vector.broadcast %209 : vector<1x32xf32> to vector<16x32xf32>
    %213 = arith.addf %211, %212 : vector<16x32xf32>
    %cst_48 = arith.constant 0.000000e+00 : f32
    %214 = vector.broadcast %cst_48 : f32 to vector<16x32xf32>
    %215 = arith.maximumf %213, %214 : vector<16x32xf32>
    %216 = arith.truncf %215 : vector<16x32xf32> to vector<16x32xbf16>
    %c256 = arith.constant 256 : index
    %c0_49 = arith.constant 0 : index
    %217 = vector.load %arg2[%c256, %c0_49] : memref<352x128xbf16, #tpu.memory_space<vmem>>, vector<32x32xbf16>
    %c288 = arith.constant 288 : index
    %c0_50 = arith.constant 0 : index
    %218 = vector.load %arg2[%c288, %c0_50] : memref<352x128xbf16, #tpu.memory_space<vmem>>, vector<1x32xbf16>
    %219 = arith.extf %218 : vector<1x32xbf16> to vector<1x32xf32>
    %cst_51 = arith.constant dense<0.000000e+00> : vector<16x32xf32>
    %220 = tpu.matmul %216, %217, %cst_51 {dimension_numbers = #tpu.dot_dimension_numbers<[1], [0], [0], [1], [0, 0, 1, 1], [], []>} : vector<16x32xbf16>, vector<32x32xbf16>, vector<16x32xf32> -> vector<16x32xf32>
    %221 = vector.broadcast %219 : vector<1x32xf32> to vector<16x32xf32>
    %222 = arith.addf %220, %221 : vector<16x32xf32>
    %cst_52 = arith.constant 0.000000e+00 : f32
    %223 = vector.broadcast %cst_52 : f32 to vector<16x32xf32>
    %224 = arith.maximumf %222, %223 : vector<16x32xf32>
    %225 = arith.truncf %224 : vector<16x32xf32> to vector<16x32xbf16>
    %c304 = arith.constant 304 : index
    %c0_53 = arith.constant 0 : index
    %226 = vector.load %arg2[%c304, %c0_53] : memref<352x128xbf16, #tpu.memory_space<vmem>>, vector<32x128xbf16>
    %c336 = arith.constant 336 : index
    %c0_54 = arith.constant 0 : index
    %227 = vector.load %arg2[%c336, %c0_54] : memref<352x128xbf16, #tpu.memory_space<vmem>>, vector<1x128xbf16>
    %228 = arith.extf %227 : vector<1x128xbf16> to vector<1x128xf32>
    %cst_55 = arith.constant dense<0.000000e+00> : vector<16x128xf32>
    %229 = tpu.matmul %225, %226, %cst_55 {dimension_numbers = #tpu.dot_dimension_numbers<[1], [0], [0], [1], [0, 0, 1, 1], [], []>} : vector<16x32xbf16>, vector<32x128xbf16>, vector<16x128xf32> -> vector<16x128xf32>
    %230 = vector.broadcast %228 : vector<1x128xf32> to vector<16x128xf32>
    %231 = arith.addf %229, %230 : vector<16x128xf32>
    %232 = math.tanh %231 : vector<16x128xf32>
    %c0_56 = arith.constant 0 : index
    %c0_57 = arith.constant 0 : index
    %233 = vector.load %arg3[%c0_56, %c0_57] : memref<16x128xf32, #tpu.memory_space<vmem>>, vector<16x128xf32>
    tpu.vector_store %arg3[%c0_56, %c0_57], %232 {strides = array<i32>} : memref<16x128xf32, #tpu.memory_space<vmem>>, vector<16x128xf32>,
    return
  }
}

</mosaic_0001>

<bundles_post_ra>
// kernel: tpu_custom_call.1
= control target key start
LH: loop header
LB: loop body
LE: loop exit
PB: predicated region body
PF: predicated region fallthrough
CT: control target
= control target key end

     0   :  { %10 = vsyncpa [#allocation4], 0  ;;  %s1846_s0 = inlined_call_operand.vmem [shape: f32[16,8], index: 0, kind: input, shape index: {}]   ;;  %s1847_s1 = inlined_call_operand.vmem [shape: f32[4,32], index: 1, kind: input, shape index: {}]   ;;  %s1848_s2 = inlined_call_operand.hbm [shape: bf16[352,128], index: 2, kind: input, shape index: {}]   ;;  %s1849_s3 = inlined_call_operand.hbm [shape: f32[16,128], index: 3, kind: output, shape index: {0}]   ;;  %s1850_s4 = inlined_call_operand.hbm [shape: f32[4,32], index: 4, kind: output, shape index: {1}]  }
   0x1   :  { %11 = vsyncpa [#allocation5], 0 }
   0x2   :  { %12 = vsyncpa [#allocation8], 0  ;;  %s1557_s15 = smov [#allocation3]   ;;  %s1485_s19 = scalar_lea.hbm %s1848_s2, 2816 }
   0x3   :  { %s22_s16 = sshll.u32 %s1557_s15, 4  ;;  %p1486_p0 = scmp.ne.s32.totalorder %s1848_s2, %s1485_s19  ;;  %s23_s16 = int_to_ptr.vmem [resolvable:$true] %s22_s16 }
   0x4   :  { %p1489_p1 = scmp.lt.u32.totalorder %s1485_s19, %s1848_s2 }
   0x6   :  { %p1491_p2 = pnand %p1489_p1, %p1486_p0 }
   0x8   :  { %1494 = shalt.err (!%p1491_p2)
}
   0x9   :  { %s1495_s24 = scalar_lea.vmem %s23_s16, 2816  ;;  %p1500_p4 = scmp.lt.s32.totalorder %s23_s16, %s23_s16 }
   0xa   :  { %p1496_p3 = scmp.ne.s32.totalorder %s23_s16, %s1495_s24  ;;  %p1501_p5 = scmp.lt.s32.totalorder %s1495_s24, %s1495_s24 }
   0xc   :  { %p1502_p6 = por %p1501_p5, %p1500_p4 }
   0xe   :  { %p1503_p7 = pnand %p1502_p6, %p1496_p3 }
  0x10   :  { %1506 = shalt.err (!%p1503_p7)
}
  0x11   :  { %s1558_s25 = smov 64   ;;  %s1559_s26 = smov 4  }
  0x12   :  { %28 = dma.hbm_to_vmem [thread:$0]  %s1848_s2, 2816, %s23_s16, [#allocation4], %s1558_s25, %s1558_s25, %s1559_s26  }
  0x13   :  { %1551 = dma.done.wait [#allocation4], 2816  }
  0x14   :  { %1552 = vsyncadd [#allocation4], 4294964480  ;;  %v1560_v0 = vmov 0.0   ;;  %vm1561_vm0 = vmmov 0   ;;  %vm47_vm1 = vcmask 1043456   ;;  %v1613_v3 = vld [vmem:[#allocation3 + $0x8] sm:$0xff]   ;;  %v39_v10 = vlaneseq }
  0x15   :  { %1306 = vmatprep.subr.bf16.mxu0 %v1560_v0  ;;  %1312 = vmatprep.subr.bf16.mxu1 %v1560_v0  ;;  %v36_v1 = vld [vmem:[#allocation3] sm:$0xf]  ;;  %v34_v5 = vld [vmem:[%s1846_s0 + $0x8] sm:$0xff]  ;;  %vm43_vm2 = vcmask 64512   ;;  %v1622_v7 = vld [vmem:[#allocation3 + $0x10] sm:$0xff]   ;;  %vm118_vm3 = vcmask 261120  }
  0x16   :  { %1308 = vmatprep.mubr.msk.bf16.mxu0 %vm1561_vm0, %v1560_v0  ;;  %1316 = vmatprep.mubr.msk.bf16.mxu1 %vm1561_vm0, %v1560_v0  ;;  %v49_v2 = vsel %vm47_vm1, %v36_v1, 0  ;;  %v33_v4 = vld [vmem:[%s1846_s0] sm:$0xff]  ;;  %v40_v11 = vshrl.u32 %v39_v10, 7  ;;  %v37_v12 = vld [vmem:[#allocation3 + $0x18] sm:$0x1]  ;;  %v97_v25 = vand.u32 127, %v39_v10 }
  0x17   :  { %1307 = vmatpush3.bf16.msra.mxu0 %v49_v2  ;;  %v35_v6 = vpack.c.bf16 %v34_v5, %v33_v4  ;;  %1313 = vmatpush3.bf16.msra.mxu1 %v1613_v3  ;;  %v103_v8 = vld [vmem:[%s1847_s1] sm:$0x3]  ;;  %v38_v13 = vunpack.c.l.bf16 %v37_v12  ;;  %v1562_v28 = vmov 0.5   ;;  %v104_v34 = vld [vmem:[%s1847_s1 + $0x2] sm:$0x3]  ;;  %s1563_s9 = smov 32  }
  0x18   :  { %1320 = vmatprep.subr.bf16.mxu0 %v1560_v0  ;;  %1314 = vmatprep.subr.bf16.mxu1 %v1560_v0  ;;  %v105_v9 = vpack.c.bf16 %v103_v8, %v103_v8  ;;  %v1644_v14 = vsub.s32 0, %v40_v11  ;;  %vm98_vm4 = vcmp.ge.s32.totalorder %v97_v25, 64  ;;  %vm99_vm5 = vcmp.lt.s32.totalorder %v97_v25, 96  ;;  %s1564_s1 = smov [#allocation7]  }
  0x19   :  { %vm100_vm6 = vmand %vm98_vm4, %vm99_vm5  ;;  %vm191_vm7 = vcmask 254976   ;;  %vm352_vm8 = vcmask 259076   ;;  %vm271_vm9 = vcmask 257026   ;;  %vm758_vm10 = vcmask 1041408   ;;  %s1218_s10 = sshll.u32 %s1564_s1, 4  ;;  %s1219_s10 = int_to_ptr.vmem [resolvable:$true] %s1218_s10 }
  0x1a   :  { %1309 = vmatmul.mubr.msk.bf16.vlgmr.msra.gmra.mrb[0].mxu0 %vm43_vm2, %v35_v6  ;;  %v42_v15 = vrot.slane %v38_v13, %v1644_v14  ;;  %v1652_v29 = vsel %vm100_vm6, 1.0, %v1562_v28  ;;  %v1654_v31 = vsel %vm100_vm6, 0.0, %v1562_v28  ;;  %vm433_vm11 = vcmask 261126   ;;  %s1507_s11 = scalar_lea.vmem %s1219_s10, 64  ;;  %p1512_p9 = scmp.lt.s32.totalorder %s1219_s10, %s1219_s10 }
  0x1b   :  { %1321 = vmatpush3.bf16.msra.mxu0 %v1613_v3  ;;  %1324 = vmatprep.mubr.msk.bf16.mxu0 %vm1561_vm0, %v1560_v0  ;;  %vm764_vm12 = vcmask 257024   ;;  %p1508_p8 = scmp.ne.s32.totalorder %s1219_s10, %s1507_s11  ;;  %p1513_p10 = scmp.lt.s32.totalorder %s1507_s11, %s1507_s11 }
  0x1c   :  { %1315 = vmatpush3.bf16.msra.mxu1 %v1622_v7  ;;  %1322 = vmatprep.subr.bf16.mxu0 %v1560_v0 }
  0x1d   :  { %1328 = vmatprep.subr.bf16.mxu1 %v1560_v0  ;;  %p1514_p11 = por %p1513_p10, %p1512_p9 }
  0x1f   :  { %1317 = vmatmul.mubr.msk.bf16.vlgmr.msra.gmra.mrb[0].mxu1 %vm118_vm3, %v105_v9  ;;  %1323 = vmatpush3.bf16.msra.mxu0 %v1622_v7  ;;  %p1515_p12 = pnand %p1514_p11, %p1508_p8 }
  0x20   :  { %1329 = vmatpush3.bf16.msra.mxu1 %v1613_v3  ;;  %1332 = vmatprep.mubr.msk.bf16.mxu1 %vm1561_vm0, %v1560_v0 }
  0x21   :  { %1330 = vmatprep.subr.bf16.mxu1 %v1560_v0  ;;  %1336 = vmatprep.subr.bf16.mxu0 %v1560_v0 }
  0x24   :  { %1331 = vmatpush3.bf16.msra.mxu1 %v1622_v7 }
  0x25   :  { %1344 = vmatprep.subr.bf16.mxu1 %v1560_v0 }
  0xed   :  { %v85_v16 = vpop.f32.mrb[0].mxu0 }
  0xee   :  { %v1310_v17 = vpop.f32.mrb[1].mxu0  ;;  %v1647_v18 = vadd.f32 %v85_v16, %v42_v15 }
  0xef   :  { %v88_v19 = vpop.f32.mrb[2].mxu0 }
  0xf0   :  { %v1649_v20 = vadd.f32 %v88_v19, %v42_v15  ;;  %v1311_v21 = vpop.f32.mrb[3].mxu0 }
  0xf2   :  { %v156_v22 = vpop.f32.mrb[0].mxu1 }
  0xf3   :  { %v162_v23 = vadd.f32 %v156_v22, %v1647_v18  ;;  %v1318_v24 = vpop.f32.mrb[1].mxu1 }
  0xf4   :  { %v159_v26 = vpop.f32.mrb[2].mxu1 }
  0xf5   :  { %1449 = vtanh.f32 %v162_v23  ;;  %v1319_v27 = vpop.f32.mrb[3].mxu1 }
  0xff   :  { %v1450_v30 = vpop.eup %1449 }
 0x100   :  { %v164_v32 = vmul.f32 %v1450_v30, %v1652_v29 }
 0x102   :  { %v165_v33 = vadd.f32 %v164_v32, %v1654_v31 }
 0x104   :  { %172 = vrot.lane.b32.xlu0 %v165_v33, %s1558_s25 }
 0x108   :  { %167 = vrot.lane.b32.xlu0 %v104_v34, %s1563_s9 }
 0x176   :  { %v173_v35 = vpop.permute.xlu0 %172 }
 0x177   :  { %v175_v36 = vmul.f32 %v173_v35, %v165_v33 }
 0x179   :  { %177 = vrot.lane.b32.xlu1 %v175_v36, %s1563_s9 }
 0x17a   :  { %v168_v37 = vpop.permute.xlu0 %167 }
 0x17b   :  { %v170_v38 = vmul.f32 %v168_v37, %v165_v33 }
 0x1eb   :  { %v178_v39 = vpop.permute.xlu1 %177 }
 0x1ec   :  { %v180_v40 = vadd.f32 %v178_v39, %v170_v38 }
 0x1ee   :  { %1451 = vtanh.f32 %v180_v40  ;;  %v248_v57 = vrot.slane %v180_v40, 6 }
 0x1f8   :  { %v1452_v41 = vpop.eup %1451 }
 0x1f9   :  { %183 = vrot.lane.b32.xlu1 %v1452_v41, %s1558_s25 }
 0x26b   :  { %v184_v42 = vpop.permute.xlu1 %183 }
 0x26c   :  { %v1665_v43 = vmul.f32 %v184_v42, %v165_v33 }
 0x26e   :  { %v193_v44 = vpack.c.bf16 %v1665_v43, %v1665_v43 }
 0x270   :  { %195 = vrot.lane.b32.xlu0 %v193_v44, %s1563_s9 }
 0x2e2   :  { %v196_v45 = vpop.permute.xlu0 %195 }
 0x2e3   :  { %1325 = vmatmul.mubr.msk.bf16.vlgmr.msra.gmra.mrb[4].mxu0 %vm118_vm3, %v196_v45 }
 0x2e4   :  { %1337 = vmatpush3.bf16.msra.mxu0 %v1613_v3  ;;  %1340 = vmatprep.mubr.msk.bf16.mxu0 %vm1561_vm0, %v1560_v0 }
 0x2e5   :  { %1338 = vmatprep.subr.bf16.mxu0 %v1560_v0 }
 0x2e8   :  { %1339 = vmatpush3.bf16.msra.mxu0 %v1622_v7 }
 0x2e9   :  { %1352 = vmatprep.subr.bf16.mxu0 %v1560_v0 }
 0x3b6   :  { %v234_v46 = vpop.f32.mrb[4].mxu0 }
 0x3b7   :  { %v241_v47 = vrot.slane %v234_v46, 6  ;;  %v1326_v48 = vpop.f32.mrb[5].mxu0 }
 0x3b8   :  { %v237_v49 = vpop.f32.mrb[6].mxu0 }
 0x3b9   :  { %v243_v50 = vadd.f32 %v241_v47, %v1647_v18  ;;  %v1327_v51 = vpop.f32.mrb[7].mxu0 }
 0x3bb   :  { %1453 = vtanh.f32 %v243_v50 }
 0x3c5   :  { %v1454_v52 = vpop.eup %1453 }
 0x3c6   :  { %v245_v53 = vmul.f32 %v1454_v52, %v1652_v29 }
 0x3c8   :  { %v246_v54 = vadd.f32 %v245_v53, %v1654_v31 }
 0x3ca   :  { %252 = vrot.lane.b32.xlu1 %v246_v54, %s1558_s25  ;;  %v250_v58 = vmul.f32 %v248_v57, %v246_v54 }
 0x43c   :  { %v253_v55 = vpop.permute.xlu1 %252 }
 0x43d   :  { %v255_v56 = vmul.f32 %v253_v55, %v246_v54 }
 0x43f   :  { %257 = vrot.lane.b32.xlu0 %v255_v56, %s1563_s9 }
 0x4b1   :  { %v258_v59 = vpop.permute.xlu0 %257 }
 0x4b2   :  { %v260_v60 = vadd.f32 %v258_v59, %v250_v58 }
 0x4b4   :  { %1455 = vtanh.f32 %v260_v60  ;;  %v329_v19 = vrot.slane %v260_v60, 6 }
 0x4be   :  { %v1456_v61 = vpop.eup %1455 }
 0x4bf   :  { %263 = vrot.lane.b32.xlu1 %v1456_v61, %s1558_s25 }
 0x531   :  { %v264_v62 = vpop.permute.xlu1 %263 }
 0x532   :  { %v1683_v63 = vmul.f32 %v264_v62, %v246_v54 }
 0x534   :  { %v273_v1 = vpack.c.bf16 %v1683_v63, %v1683_v63 }
 0x536   :  { %v275_v2 = vrot.slane %v273_v1, 1 }
 0x538   :  { %276 = vrot.lane.b32.xlu0 %v275_v2, %s1563_s9 }
 0x5aa   :  { %v277_v4 = vpop.permute.xlu0 %276 }
 0x5ab   :  { %1333 = vmatmul.mubr.msk.bf16.vlgmr.msra.gmra.mrb[4].mxu1 %vm118_vm3, %v277_v4 }
 0x5ac   :  { %1345 = vmatpush3.bf16.msra.mxu1 %v1613_v3  ;;  %1348 = vmatprep.mubr.msk.bf16.mxu1 %vm1561_vm0, %v1560_v0 }
 0x5ad   :  { %1346 = vmatprep.subr.bf16.mxu1 %v1560_v0 }
 0x5b0   :  { %1347 = vmatpush3.bf16.msra.mxu1 %v1622_v7 }
 0x5b1   :  { %1360 = vmatprep.subr.bf16.mxu1 %v1560_v0 }
 0x67e   :  { %v315_v5 = vpop.f32.mrb[4].mxu1 }
 0x67f   :  { %v322_v6 = vrot.slane %v315_v5, 4  ;;  %v1334_v8 = vpop.f32.mrb[5].mxu1 }
 0x680   :  { %v318_v9 = vpop.f32.mrb[6].mxu1 }
 0x681   :  { %v324_v10 = vadd.f32 %v322_v6, %v1647_v18  ;;  %v1335_v11 = vpop.f32.mrb[7].mxu1 }
 0x683   :  { %1457 = vtanh.f32 %v324_v10 }
 0x68d   :  { %v1458_v12 = vpop.eup %1457 }
 0x68e   :  { %v326_v13 = vmul.f32 %v1458_v12, %v1652_v29 }
 0x690   :  { %v327_v15 = vadd.f32 %v326_v13, %v1654_v31 }
 0x692   :  { %333 = vrot.lane.b32.xlu1 %v327_v15, %s1558_s25  ;;  %v331_v21 = vmul.f32 %v329_v19, %v327_v15 }
 0x704   :  { %v334_v16 = vpop.permute.xlu1 %333 }
 0x705   :  { %v336_v17 = vmul.f32 %v334_v16, %v327_v15 }
 0x707   :  { %338 = vrot.lane.b32.xlu0 %v336_v17, %s1563_s9 }
 0x779   :  { %v339_v22 = vpop.permute.xlu0 %338 }
 0x77a   :  { %v341_v23 = vadd.f32 %v339_v22, %v331_v21 }
 0x77c   :  { %1459 = vtanh.f32 %v341_v23  ;;  %v410_v44 = vrot.slane %v341_v23, 6 }
 0x786   :  { %v1460_v24 = vpop.eup %1459 }
 0x787   :  { %344 = vrot.lane.b32.xlu1 %v1460_v24, %s1558_s25 }
 0x7f9   :  { %v345_v25 = vpop.permute.xlu1 %344 }
 0x7fa   :  { %v1701_v26 = vmul.f32 %v345_v25, %v327_v15 }
 0x7fc   :  { %v354_v27 = vpack.c.bf16 %v1701_v26, %v1701_v26 }
 0x7fe   :  { %v356_v28 = vrot.slane %v354_v27, 2 }
 0x800   :  { %357 = vrot.lane.b32.xlu0 %v356_v28, %s1563_s9 }
 0x872   :  { %v358_v30 = vpop.permute.xlu0 %357 }
 0x873   :  { %1341 = vmatmul.mubr.msk.bf16.vlgmr.msra.gmra.mrb[8].mxu0 %vm118_vm3, %v358_v30 }
 0x874   :  { %1353 = vmatpush3.bf16.msra.mxu0 %v1613_v3  ;;  %1356 = vmatprep.mubr.msk.bf16.mxu0 %vm1561_vm0, %v1560_v0 }
 0x875   :  { %1354 = vmatprep.subr.bf16.mxu0 %v1560_v0 }
 0x878   :  { %1355 = vmatpush3.bf16.msra.mxu0 %v1622_v7 }
 0x879   :  { %1368 = vmatprep.subr.bf16.mxu0 %v1560_v0 }
 0x946   :  { %v396_v32 = vpop.f32.mrb[8].mxu0 }
 0x947   :  { %v403_v33 = vrot.slane %v396_v32, 2  ;;  %v1342_v34 = vpop.f32.mrb[9].mxu0 }
 0x948   :  { %v399_v35 = vpop.f32.mrb[10].mxu0 }
 0x949   :  { %v405_v36 = vadd.f32 %v403_v33, %v1647_v18  ;;  %v1343_v37 = vpop.f32.mrb[11].mxu0 }
 0x94b   :  { %1461 = vtanh.f32 %v405_v36 }
 0x955   :  { %v1462_v38 = vpop.eup %1461 }
 0x956   :  { %v407_v39 = vmul.f32 %v1462_v38, %v1652_v29 }
 0x958   :  { %v408_v40 = vadd.f32 %v407_v39, %v1654_v31 }
 0x95a   :  { %414 = vrot.lane.b32.xlu1 %v408_v40, %s1558_s25  ;;  %v412_v45 = vmul.f32 %v410_v44, %v408_v40 }
 0x9cc   :  { %v415_v41 = vpop.permute.xlu1 %414 }
 0x9cd   :  { %v417_v42 = vmul.f32 %v415_v41, %v408_v40 }
 0x9cf   :  { %419 = vrot.lane.b32.xlu0 %v417_v42, %s1563_s9 }
 0xa41   :  { %v420_v46 = vpop.permute.xlu0 %419 }
 0xa42   :  { %v422_v47 = vadd.f32 %v420_v46, %v412_v45 }
 0xa44   :  { %1463 = vtanh.f32 %v422_v47  ;;  %v488_v1 = vrot.slane %v422_v47, 6 }
 0xa4e   :  { %v1464_v48 = vpop.eup %1463 }
 0xa4f   :  { %425 = vrot.lane.b32.xlu1 %v1464_v48, %s1558_s25 }
 0xac1   :  { %v426_v18 = vpop.permute.xlu1 %425 }
 0xac2   :  { %v1719_v49 = vmul.f32 %v426_v18, %v408_v40 }
 0xac4   :  { %v435_v50 = vpack.c.bf16 %v1719_v49, %v1719_v49 }
 0xac6   :  { %v437_v51 = vrot.slane %v435_v50, 3 }
 0xac8   :  { %438 = vrot.lane.b32.xlu0 %v437_v51, %s1563_s9 }
 0xb3a   :  { %v439_v52 = vpop.permute.xlu0 %438 }
 0xb3b   :  { %1349 = vmatmul.mubr.msk.bf16.vlgmr.msra.gmra.mrb[8].mxu1 %vm118_vm3, %v439_v52 }
 0xb3c   :  { %1361 = vmatpush3.bf16.msra.mxu1 %v1613_v3  ;;  %1364 = vmatprep.mubr.msk.bf16.mxu1 %vm1561_vm0, %v1560_v0 }
 0xb3d   :  { %1362 = vmatprep.subr.bf16.mxu1 %v1560_v0 }
 0xb40   :  { %1363 = vmatpush3.bf16.msra.mxu1 %v1622_v7 }
 0xb41   :  { %1376 = vmatprep.subr.bf16.mxu1 %v1560_v0 }
 0xc0e   :  { %v477_v53 = vpop.f32.mrb[8].mxu1 }
 0xc0f   :  { %v483_v54 = vadd.f32 %v477_v53, %v1649_v20  ;;  %v1350_v55 = vpop.f32.mrb[9].mxu1 }
 0xc10   :  { %v480_v56 = vpop.f32.mrb[10].mxu1 }
 0xc11   :  { %1465 = vtanh.f32 %v483_v54  ;;  %v1351_v57 = vpop.f32.mrb[11].mxu1 }
 0xc1b   :  { %v1466_v58 = vpop.eup %1465 }
 0xc1c   :  { %v485_v59 = vmul.f32 %v1466_v58, %v1652_v29 }
 0xc1e   :  { %v486_v60 = vadd.f32 %v485_v59, %v1654_v31 }
 0xc20   :  { %492 = vrot.lane.b32.xlu1 %v486_v60, %s1558_s25  ;;  %v490_v2 = vmul.f32 %v488_v1, %v486_v60 }
 0xc92   :  { %v493_v61 = vpop.permute.xlu1 %492 }
 0xc93   :  { %v495_v62 = vmul.f32 %v493_v61, %v486_v60 }
 0xc95   :  { %497 = vrot.lane.b32.xlu0 %v495_v62, %s1563_s9 }
 0xd07   :  { %v498_v4 = vpop.permute.xlu0 %497 }
 0xd08   :  { %v500_v5 = vadd.f32 %v498_v4, %v490_v2 }
 0xd0a   :  { %1467 = vtanh.f32 %v500_v5 }
 0xd14   :  { %v1468_v6 = vpop.eup %1467 }
 0xd15   :  { %503 = vrot.lane.b32.xlu1 %v1468_v6, %s1558_s25 }
 0xd87   :  { %v504_v8 = vpop.permute.xlu1 %503 }
 0xd88   :  { %v1737_v9 = vmul.f32 %v504_v8, %v486_v60 }
 0xd8a   :  { %v512_v10 = vpack.c.bf16 %v1737_v9, %v1737_v9 }
 0xd8c   :  { %514 = vrot.lane.b32.xlu0 %v512_v10, %s1563_s9 }
 0xdfe   :  { %v515_v11 = vpop.permute.xlu0 %514 }
 0xdff   :  { %1357 = vmatmul.mubr.msk.bf16.vlgmr.msra.gmra.mrb[12].mxu0 %vm118_vm3, %v515_v11 }
 0xe00   :  { %1369 = vmatpush3.bf16.msra.mxu0 %v1613_v3  ;;  %1372 = vmatprep.mubr.msk.bf16.mxu0 %vm1561_vm0, %v1560_v0 }
 0xe01   :  { %1370 = vmatprep.subr.bf16.mxu0 %v1560_v0 }
 0xe04   :  { %1371 = vmatpush3.bf16.msra.mxu0 %v1622_v7  ;;  %v567_v7 = vrot.slane %v500_v5, 6 }
 0xed2   :  { %v553_v12 = vpop.f32.mrb[12].mxu0 }
 0xed3   :  { %v560_v13 = vrot.slane %v553_v12, 6  ;;  %v1358_v15 = vpop.f32.mrb[13].mxu0 }
 0xed4   :  { %v556_v16 = vpop.f32.mrb[14].mxu0 }
 0xed5   :  { %v562_v17 = vadd.f32 %v560_v13, %v1649_v20  ;;  %v1359_v19 = vpop.f32.mrb[15].mxu0  ;;  %v1437_v16 = vld [vmem:[#allocation3 + $0x20] sm:$0xff]  }
 0xed7   :  { %1469 = vtanh.f32 %v562_v17  ;;  %v1438_v17 = vld [vmem:[#allocation3 + $0x28] sm:$0xff]  }
 0xee1   :  { %v1470_v21 = vpop.eup %1469 }
 0xee2   :  { %v564_v22 = vmul.f32 %v1470_v21, %v1652_v29 }
 0xee4   :  { %v565_v3 = vadd.f32 %v564_v22, %v1654_v31 }
 0xee6   :  { %571 = vrot.lane.b32.xlu1 %v565_v3, %s1558_s25  ;;  %v569_v25 = vmul.f32 %v567_v7, %v565_v3 }
 0xf58   :  { %v572_v23 = vpop.permute.xlu1 %571 }
 0xf59   :  { %v574_v24 = vmul.f32 %v572_v23, %v565_v3 }
 0xf5b   :  { %576 = vrot.lane.b32.xlu0 %v574_v24, %s1563_s9 }
 0xfcd   :  { %v577_v27 = vpop.permute.xlu0 %576 }
 0xfce   :  { %v579_v28 = vadd.f32 %v577_v27, %v569_v25 }
 0xfd0   :  { %1471 = vtanh.f32 %v579_v28  ;;  %v647_v18 = vrot.slane %v579_v28, 6 }
 0xfda   :  { %v1472_v30 = vpop.eup %1471 }
 0xfdb   :  { %582 = vrot.lane.b32.xlu1 %v1472_v30, %s1558_s25 }
0x104d   :  { %v583_v32 = vpop.permute.xlu1 %582 }
0x104e   :  { %v1754_v33 = vmul.f32 %v583_v32, %v565_v3  ;;  %v1439_v32 = vld [vmem:[#allocation3 + $0x40] sm:$0xff]  }
0x104f   :  { %1384 = vmatprep.subr.bf16.mxu0 %v1439_v32 }
0x1050   :  { %v591_v34 = vpack.c.bf16 %v1754_v33, %v1754_v33 }
0x1052   :  { %v593_v35 = vrot.slane %v591_v34, 1  ;;  %v773_v34 = vld [vmem:[#allocation3 + $0x38] sm:$0x1] }
0x1054   :  { %594 = vrot.lane.b32.xlu0 %v593_v35, %s1563_s9  ;;  %v775_v35 = vld [vmem:[#allocation3 + $0x30] sm:$0x1] }
0x10c6   :  { %v595_v36 = vpop.permute.xlu0 %594 }
0x10c7   :  { %1365 = vmatmul.mubr.msk.bf16.vlgmr.msra.gmra.mrb[12].mxu1 %vm118_vm3, %v595_v36  ;;  %v774_v36 = vunpack.c.l.bf16 %v773_v34  ;;  %v1447_v34 = vld [vmem:[#allocation3 + $0x98] sm:$0xff]  }
0x10c8   :  { %1380 = vmatprep.mubr.msk.bf16.mxu1 %vm1561_vm0, %v1560_v0  ;;  %1377 = vmatpush3.bf16.msra.mxu1 %v1437_v16 }
0x10c9   :  { %1378 = vmatprep.subr.bf16.mxu1 %v1560_v0 }
0x10cc   :  { %1379 = vmatpush3.bf16.msra.mxu1 %v1438_v17  ;;  %v1445_v17 = vld [vmem:[#allocation3 + $0x80] sm:$0xff]  }
0x10cd   :  { %1392 = vmatprep.subr.bf16.mxu1 %v1560_v0 }
0x119a   :  { %v633_v37 = vpop.f32.mrb[12].mxu1 }
0x119b   :  { %v640_v38 = vrot.slane %v633_v37, 4  ;;  %v1366_v39 = vpop.f32.mrb[13].mxu1  ;;  %v776_v37 = vunpack.c.l.bf16 %v775_v35  ;;  %v1448_v35 = vld [vmem:[#allocation3 + $0xa0] sm:$0xff]  }
0x119c   :  { %v636_v40 = vpop.f32.mrb[14].mxu1 }
0x119d   :  { %v642_v41 = vadd.f32 %v640_v38, %v1649_v20  ;;  %v1367_v42 = vpop.f32.mrb[15].mxu1  ;;  %v780_v38 = vrot.slane %v774_v36, %v1644_v14  ;;  %v840_v39 = vrot.slane %v776_v37, %v1644_v14  ;;  %v1065_v36 = vld [vmem:[#allocation3 + $0x90] sm:$0x1] }
0x119e   :  { %v1066_v37 = vunpack.c.l.bf16 %v1065_v36 }
0x119f   :  { %1473 = vtanh.f32 %v642_v41 }
0x11a9   :  { %v1474_v44 = vpop.eup %1473 }
0x11aa   :  { %v644_v45 = vmul.f32 %v1474_v44, %v1652_v29 }
0x11ac   :  { %v645_v46 = vadd.f32 %v644_v45, %v1654_v31 }
0x11ae   :  { %651 = vrot.lane.b32.xlu1 %v645_v46, %s1558_s25  ;;  %v649_v50 = vmul.f32 %v647_v18, %v645_v46 }
0x1220   :  { %v652_v47 = vpop.permute.xlu1 %651 }
0x1221   :  { %v654_v48 = vmul.f32 %v652_v47, %v645_v46 }
0x1223   :  { %656 = vrot.lane.b32.xlu0 %v654_v48, %s1563_s9 }
0x1295   :  { %v657_v51 = vpop.permute.xlu0 %656 }
0x1296   :  { %v659_v52 = vadd.f32 %v657_v51, %v649_v50 }
0x1298   :  { %1475 = vtanh.f32 %v659_v52 }
0x12a2   :  { %v1476_v53 = vpop.eup %1475 }
0x12a3   :  { %662 = vrot.lane.b32.xlu1 %v1476_v53, %s1558_s25 }
0x1315   :  { %v663_v54 = vpop.permute.xlu1 %662 }
0x1316   :  { %v665_v55 = vmul.f32 %v663_v54, %v645_v46  ;;  %v1441_v54 = vld [vmem:[#allocation3 + $0x68] sm:$0xff]  }
0x1318   :  { %v671_v56 = vpack.c.bf16 %v665_v55, %v665_v55 }
0x131a   :  { %v673_v57 = vrot.slane %v671_v56, 2  ;;  %v1442_v56 = vld [vmem:[#allocation3 + $0x70] sm:$0xff]  }
0x131c   :  { %674 = vrot.lane.b32.xlu0 %v673_v57, %s1563_s9  ;;  %v1443_v57 = vld [vmem:[#allocation3 + $0x58] sm:$0xff]  }
0x138e   :  { %v675_v58 = vpop.permute.xlu0 %674 }
0x138f   :  { %1373 = vmatmul.mubr.msk.bf16.vlgmr.msra.gmra.mrb[16].mxu0 %vm118_vm3, %v675_v58  ;;  %v1444_v58 = vld [vmem:[#allocation3 + $0x60] sm:$0xff]  }
0x1390   :  { %1385 = vmatpush3.bf16.msra.mxu0 %v1439_v32 }
0x1462   :  { %v713_v59 = vpop.f32.mrb[16].mxu0 }
0x1463   :  { %v720_v60 = vrot.slane %v713_v59, 2  ;;  %v1374_v61 = vpop.f32.mrb[17].mxu0  ;;  %v853_v59 = vld [vmem:[#allocation3 + $0x50] sm:$0x1] }
0x1464   :  { %v716_v62 = vpop.f32.mrb[18].mxu0 }
0x1465   :  { %v722_v1 = vadd.f32 %v720_v60, %v1649_v20  ;;  %v1375_v2 = vpop.f32.mrb[19].mxu0  ;;  %v727_v20 = vrot.slane %v659_v52, 6  ;;  %v854_v60 = vunpack.c.l.bf16 %v853_v59 }
0x1467   :  { %1477 = vtanh.f32 %v722_v1  ;;  %v858_v61 = vrot.slane %v854_v60, %v1644_v14 }
0x1471   :  { %v1478_v4 = vpop.eup %1477 }
0x1472   :  { %v724_v5 = vmul.f32 %v1478_v4, %v1652_v29 }
0x1474   :  { %v725_v6 = vadd.f32 %v724_v5, %v1654_v31 }
0x1476   :  { %731 = vrot.lane.b32.xlu1 %v725_v6, %s1558_s25  ;;  %v729_v29 = vmul.f32 %v727_v20, %v725_v6 }
0x14e8   :  { %v732_v8 = vpop.permute.xlu1 %731 }
0x14e9   :  { %v734_v10 = vmul.f32 %v732_v8, %v725_v6 }
0x14eb   :  { %736 = vrot.lane.b32.xlu0 %v734_v10, %s1563_s9 }
0x14ef   :  { %188 = vrot.lane.b32.xlu0 %v1665_v43, %s1563_s9 }
0x14f3   :  { %349 = vrot.lane.b32.xlu0 %v1701_v26, %s1563_s9 }
0x14f7   :  { %508 = vrot.lane.b32.xlu0 %v1737_v9, %s1563_s9 }
0x14fb   :  { %667 = vrot.lane.b32.xlu0 %v665_v55, %s1563_s9 }
0x155d   :  { %v737_v31 = vpop.permute.xlu0 %736 }
0x155e   :  { %v739_v11 = vadd.f32 %v737_v31, %v729_v29 }
0x1560   :  { %1479 = vtanh.f32 %v739_v11  ;;  %v754_v12 = vrot.slane %v739_v11, 4 }
0x1561   :  { %v189_v13 = vpop.permute.xlu0 %188 }
0x1562   :  { %192 = vst.msk [vmem:[#allocation2] sm:$0x3] %vm191_vm7, %v189_v13  ;;  %755 = vrot.lane.b32.xlu0 %v754_v12, %s1558_s25 }
0x1565   :  { %v350_v43 = vpop.permute.xlu0 %349 }
0x1566   :  { %353 = vst.msk [vmem:[#allocation2] sm:$0x30] %vm352_vm8, %v350_v43 }
0x1569   :  { %v509_v26 = vpop.permute.xlu0 %508 }
0x156a   :  { %v1480_v15 = vpop.eup %1479  ;;  %511 = vst.msk [vmem:[#allocation2 + $0x8] sm:$0x3] %vm191_vm7, %v509_v26 }
0x156b   :  { %742 = vrot.lane.b32.xlu1 %v1480_v15, %s1558_s25 }
0x156d   :  { %v668_v9 = vpop.permute.xlu0 %667 }
0x156e   :  { %670 = vst.msk [vmem:[#allocation2 + $0x8] sm:$0x30] %vm352_vm8, %v668_v9 }
0x156f   :  { %268 = vrot.lane.b32.xlu1 %v1683_v63, %s1563_s9 }
0x1573   :  { %430 = vrot.lane.b32.xlu1 %v1719_v49, %s1563_s9 }
0x1577   :  { %587 = vrot.lane.b32.xlu1 %v1754_v33, %s1563_s9  ;;  %v1440_v33 = vld [vmem:[#allocation3 + $0x48] sm:$0xff]  }
0x1578   :  { %1386 = vmatprep.subr.bf16.mxu0 %v1440_v33 }
0x1579   :  { %1387 = vmatpush3.bf16.msra.mxu0 %v1440_v33 }
0x157a   :  { %1400 = vmatprep.subr.bf16.mxu0 %v1560_v0 }
0x15d4   :  { %v756_v63 = vpop.permute.xlu0 %755 }
0x15dd   :  { %v743_v19 = vpop.permute.xlu1 %742 }
0x15de   :  { %v745_v21 = vmul.f32 %v743_v19, %v725_v6  ;;  %v1446_v19 = vld [vmem:[#allocation3 + $0x88] sm:$0xff]  }
0x15e0   :  { %v751_v22 = vrot.slane %v745_v21, 6  ;;  %747 = vrot.lane.b32.xlu1 %v745_v21, %s1563_s9  ;;  %v997_v21 = vld [vmem:[#allocation3 + $0x78] sm:$0x1] }
0x15e1   :  { %v269_v49 = vpop.permute.xlu1 %268 }
0x15e2   :  { %272 = vst.msk [vmem:[#allocation2] sm:$0xc] %vm271_vm9, %v269_v49  ;;  %v759_v3 = vsel %vm758_vm10, %v751_v22, %v756_v63  ;;  %v998_v22 = vunpack.c.l.bf16 %v997_v21 }
0x15e4   :  { %761 = vrot.lane.b32.xlu1 %v759_v3, %s1563_s9  ;;  %v1055_v63 = vrot.slane %v998_v22, %v1644_v14 }
0x15e5   :  { %v431_v23 = vpop.permute.xlu1 %430 }
0x15e6   :  { %434 = vst.msk [vmem:[#allocation2] sm:$0xc0] %vm433_vm11, %v431_v23 }
0x15e9   :  { %v588_v24 = vpop.permute.xlu1 %587 }
0x15ea   :  { %590 = vst.msk [vmem:[#allocation2 + $0x8] sm:$0xc] %vm271_vm9, %v588_v24 }
0x15ed   :  { %v766_v27 = vld [vmem:[#allocation2] sm:$0xff] }
0x1652   :  { %v748_v7 = vpop.permute.xlu1 %747 }
0x1653   :  { %750 = vst.msk [vmem:[#allocation2 + $0x8] sm:$0xc0] %vm433_vm11, %v748_v7 }
0x1656   :  { %v762_v25 = vpop.permute.xlu1 %761 }
0x1657   :  { %765 = vst.msk [vmem:[#allocation7] sm:$0xf] %vm764_vm12, %v762_v25 }
0x165a   :  { %v767_v28 = vld [vmem:[#allocation2 + $0x8] sm:$0xff] }
0x165b   :  { %v768_v30 = vpack.c.bf16 %v767_v28, %v766_v27 }
0x165d   :  { %1381 = vmatmul.mubr.msk.bf16.vlgmr.msra.gmra.mrb[16].mxu1 %vm118_vm3, %v768_v30 }
0x165e   :  { %1396 = vmatprep.mubr.msk.bf16.mxu1 %vm1561_vm0, %v1560_v0  ;;  %1393 = vmatpush3.bf16.msra.mxu1 %v1443_v57 }
0x165f   :  { %1394 = vmatprep.subr.bf16.mxu1 %v1560_v0 }
0x1662   :  { %1395 = vmatpush3.bf16.msra.mxu1 %v1444_v58 }
0x1663   :  { %1408 = vmatprep.subr.bf16.mxu1 %v1560_v0 }
0x1730   :  { %v830_v40 = vpop.f32.mrb[16].mxu1 }
0x1731   :  { %v831_v41 = vadd.f32 %v830_v40, %v780_v38  ;;  %v1382_v42 = vpop.f32.mrb[17].mxu1 }
0x1732   :  { %v833_v44 = vpop.f32.mrb[18].mxu1 }
0x1733   :  { %v841_v45 = vadd.f32 %v840_v39, %v831_v41  ;;  %v834_v46 = vadd.f32 %v833_v44, %v780_v38  ;;  %v1383_v47 = vpop.f32.mrb[19].mxu1  ;;  %v843_v48 = vmax.f32 %v831_v41, 0.0  ;;  %v1070_v38 = vrot.slane %v1066_v37, %v1644_v14 }
0x1735   :  { %v842_v18 = vadd.f32 %v840_v39, %v834_v46  ;;  %v844_v50 = vmax.f32 %v834_v46, 0.0  ;;  %v845_v51 = vmax.f32 %v841_v45, 0.0 }
0x1737   :  { %v846_v52 = vmax.f32 %v842_v18, 0.0  ;;  %v847_v53 = vpack.c.bf16 %v844_v50, %v843_v48 }
0x1739   :  { %v848_v55 = vpack.c.bf16 %v846_v52, %v845_v51  ;;  %1388 = vmatprep.mubr.msk.bf16.mxu0 %vm118_vm3, %v847_v53 }
0x173b   :  { %1389 = vmatmul.mubr.msk.bf16.vlgmr.msra.gmra.mrb[20].mxu0 %vm118_vm3, %v848_v55 }
0x173c   :  { %1401 = vmatpush3.bf16.msra.mxu0 %v1441_v54  ;;  %1404 = vmatprep.mubr.msk.bf16.mxu0 %vm1561_vm0, %v1560_v0 }
0x173d   :  { %1402 = vmatprep.subr.bf16.mxu0 %v1560_v0 }
0x1740   :  { %1403 = vmatpush3.bf16.msra.mxu0 %v1442_v56 }
0x1741   :  { %1416 = vmatprep.subr.bf16.mxu0 %v1560_v0 }
0x1743   :  { %1405 = vmatmul.mubr.msk.bf16.vlgmr.msra.gmra.mrb[24].mxu0 %vm118_vm3, %v768_v30 }
0x1744   :  { %1420 = vmatprep.mubr.msk.bf16.mxu0 %vm1561_vm0, %v1560_v0  ;;  %1417 = vmatpush3.bf16.msra.mxu0 %v1447_v34 }
0x1745   :  { %1418 = vmatprep.subr.bf16.mxu0 %v1560_v0 }
0x1748   :  { %1419 = vmatpush3.bf16.msra.mxu0 %v1448_v35 }
0x180e   :  { %v1390_v62 = vpop.f32.mrb[20].mxu0 }
0x180f   :  { %v920_v1 = vadd.f32 %v1390_v62, %v858_v61  ;;  %v911_v2 = vpop.f32.mrb[21].mxu0 }
0x1810   :  { %v912_v4 = vadd.f32 %v911_v2, %v858_v61  ;;  %v1391_v5 = vpop.f32.mrb[22].mxu0 }
0x1811   :  { %v928_v6 = vmax.f32 %v920_v1, 0.0  ;;  %v923_v8 = vadd.f32 %v1391_v5, %v858_v61  ;;  %v914_v10 = vpop.f32.mrb[23].mxu0 }
0x1812   :  { %v926_v20 = vmax.f32 %v912_v4, 0.0  ;;  %v915_v29 = vadd.f32 %v914_v10, %v858_v61 }
0x1813   :  { %v929_v31 = vmax.f32 %v923_v8, 0.0 }
0x1814   :  { %v930_v11 = vsub.f32 %v926_v20, %v928_v6  ;;  %v927_v12 = vmax.f32 %v915_v29, 0.0 }
0x1816   :  { %v931_v13 = vsub.f32 %v927_v12, %v929_v31  ;;  %v1045_v43 = vpop.f32.mrb[24].mxu0 }
0x1817   :  { %v1406_v26 = vpop.f32.mrb[25].mxu0 }
0x1818   :  { %v932_v15 = vpack.c.bf16 %v931_v13, %v930_v11  ;;  %v1048_v9 = vpop.f32.mrb[26].mxu0 }
0x1819   :  { %v1407_v16 = vpop.f32.mrb[27].mxu0 }
0x181a   :  { %1397 = vmatmul.mubr.msk.bf16.vlgmr.msra.gmra.mrb[20].mxu1 %vm118_vm3, %v932_v15 }
0x181b   :  { %1412 = vmatprep.mubr.msk.bf16.mxu1 %vm1561_vm0, %v1560_v0  ;;  %1409 = vmatpush3.bf16.msra.mxu1 %v1445_v17 }
0x181c   :  { %1410 = vmatprep.subr.bf16.mxu1 %v1560_v0 }
0x181f   :  { %1411 = vmatpush3.bf16.msra.mxu1 %v1446_v19 }
0x18ed   :  { %v986_v49 = vpop.f32.mrb[20].mxu1 }
0x18ee   :  { %v1046_v3 = vadd.f32 %v1045_v43, %v986_v49  ;;  %v1398_v23 = vpop.f32.mrb[21].mxu1 }
0x18ef   :  { %v989_v24 = vpop.f32.mrb[22].mxu1 }
0x18f0   :  { %v1056_v7 = vadd.f32 %v1055_v63, %v1046_v3  ;;  %v1049_v25 = vadd.f32 %v1048_v9, %v989_v24  ;;  %v1399_v27 = vpop.f32.mrb[23].mxu1 }
0x18f2   :  { %v1057_v28 = vadd.f32 %v1055_v63, %v1049_v25  ;;  %v1058_v30 = vmax.f32 %v1056_v7, 0.0 }
0x18f4   :  { %v1059_v32 = vmax.f32 %v1057_v28, 0.0 }
0x18f6   :  { %v1060_v33 = vpack.c.bf16 %v1059_v32, %v1058_v30 }
0x18f8   :  { %1413 = vmatmul.mubr.msk.bf16.vlgmr.msra.gmra.mrb[24].mxu1 %vm118_vm3, %v1060_v33 }
0x19cb   :  { %v1120_v39 = vpop.f32.mrb[24].mxu1 }
0x19cc   :  { %v1121_v40 = vadd.f32 %v1120_v39, %v1070_v38  ;;  %v1414_v41 = vpop.f32.mrb[25].mxu1 }
0x19cd   :  { %v1123_v42 = vpop.f32.mrb[26].mxu1 }
0x19ce   :  { %v1124_v44 = vadd.f32 %v1123_v42, %v1070_v38  ;;  %v1415_v45 = vpop.f32.mrb[27].mxu1  ;;  %v1127_v46 = vmax.f32 %v1121_v40, 0.0 }
0x19d0   :  { %v1128_v47 = vmax.f32 %v1124_v44, 0.0 }
0x19d2   :  { %v1129_v48 = vpack.c.bf16 %v1128_v47, %v1127_v46 }
0x19d4   :  { %1421 = vmatmul.mubr.msk.bf16.vlgmr.msra.gmra.mrb[28].mxu0 %vm118_vm3, %v1129_v48 }
0x19d5   :  { %1518 = shalt.err (!%p1515_p12)
}
0x19d6   :  { %s1519_s14 = scalar_lea.hbm %s1850_s4, 64 }
0x19d7   :  { %p1520_p13 = scmp.ne.s32.totalorder %s1850_s4, %s1519_s14  ;;  %p1523_p0 = scmp.lt.u32.totalorder %s1519_s14, %s1850_s4 }
0x19d9   :  { %p1525_p1 = pnand %p1523_p0, %p1520_p13 }
0x19db   :  { %1528 = shalt.err (!%p1525_p1)
}
0x19dc   :  { %1221 = dma.vmem_to_hbm [thread:$0]  %s1219_s10, 64, %s1850_s4, [#allocation8]   ;;  %v1134_v0 = vld [vmem:[#allocation3 + $0xa8] sm:$0x1] }
0x19dd   :  { %v1135_v18 = vunpack.c.l.bf16 %v1134_v0  ;;  %s1565_s21 = smov [#allocation6]  }
0x19de   :  { %s1205_s22 = sshll.u32 %s1565_s21, 4  ;;  %s1206_s22 = int_to_ptr.vmem [resolvable:$true] %s1205_s22 }
0x19df   :  { %v1139_v50 = vrot.slane %v1135_v18, %v1644_v14  ;;  %s1529_s4 = scalar_lea.vmem %s1206_s22, 256  ;;  %p1534_p3 = scmp.lt.s32.totalorder %s1206_s22, %s1206_s22 }
0x19e0   :  { %p1530_p2 = scmp.ne.s32.totalorder %s1206_s22, %s1529_s4  ;;  %p1535_p4 = scmp.lt.s32.totalorder %s1529_s4, %s1529_s4 }
0x19e2   :  { %p1536_p5 = por %p1535_p4, %p1534_p3 }
0x19e4   :  { %p1537_p6 = pnand %p1536_p5, %p1530_p2 }
0x1aa7   :  { %v1189_v51 = vpop.f32.mrb[28].mxu0 }
0x1aa8   :  { %v1190_v52 = vadd.f32 %v1189_v51, %v1139_v50  ;;  %v1422_v53 = vpop.f32.mrb[29].mxu0 }
0x1aa9   :  { %v1192_v54 = vpop.f32.mrb[30].mxu0 }
0x1aaa   :  { %1481 = vtanh.f32 %v1190_v52  ;;  %v1193_v55 = vadd.f32 %v1192_v54, %v1139_v50  ;;  %v1423_v56 = vpop.f32.mrb[31].mxu0 }
0x1aac   :  { %1483 = vtanh.f32 %v1193_v55 }
0x1ab4   :  { %v1482_v57 = vpop.eup %1481 }
0x1ab5   :  { %1198 = vst [vmem:[#allocation6] sm:$0xff] %v1482_v57 }
0x1ab6   :  { %v1484_v58 = vpop.eup %1483 }
0x1ab7   :  { %1199 = vst [vmem:[#allocation6 + $0x8] sm:$0xff] %v1484_v58 }
0x1ab8   :  { %1540 = shalt.err (!%p1537_p6)
}
0x1ab9   :  { %s1541_s25 = scalar_lea.hbm %s1849_s3, 256 }
0x1aba   :  { %p1542_p7 = scmp.ne.s32.totalorder %s1849_s3, %s1541_s25  ;;  %p1545_p8 = scmp.lt.u32.totalorder %s1541_s25, %s1849_s3 }
0x1abc   :  { %p1547_p9 = pnand %p1545_p8, %p1542_p7 }
0x1abe   :  { %1550 = shalt.err (!%p1547_p9)
}
0x1abf   :  { %s1566_s29 = smov 128   ;;  %s1567_s30 = smov 8  }
0x1ac0   :  { %1211 = dma.vmem_to_hbm [thread:$0]  %s1206_s22, 256, %s1849_s3, [#allocation5], %s1566_s29, %s1566_s29, %s1567_s30  }
0x1ac1   :  { %1553 = dma.done.wait [#allocation5], 256  }
0x1ac2   :  { %1554 = vsyncadd [#allocation5], 4294967040 }
0x1ac3   :  { %1555 = dma.done.wait [#allocation8], 64  }
0x1ac4   :  { %1556 = vsyncadd [#allocation8], 4294967232 }
0x1ac5   :  { %1228 = vsyncpa [#allocation4], 1 }
0x1ac6   :  { %1229 = vsyncpa [#allocation5], 1 }
0x1ac7   :  { %1230 = vsyncpa [#allocation8], 1 }

</bundles_post_ra>
